<compile_context>
chip_gen: v6e
topology: v6e:2x2x1
jax: 0.10.0
libtpu: 0.0.40
codegen_flags: <defaults>
</compile_context>

<pallas_src>
import functools

import jax
import jax.numpy as jnp
from jax.experimental import pallas as pl
from jax.experimental.pallas import tpu as pltpu

EPS = 1e-5


# --------------------------------- kernel ----------------------------------
def resblock_kernel(x_ref, w1_ref, w2_ref,
                    g1_ref, bt1_ref, g2_ref, bt2_ref, ge_ref, bte_ref,
                    a2_ref, out_ref, *, H):
    NH, WC = out_ref.shape            # NH = N*H rows; WC = W*Cout lanes (mult of 128)

    a_avg2 = a2_ref[...]              # (2*WC, 2*WC) block-diag channel averaging

    # Per-image boundary-row masks for the dy = -1 / +1 conv taps (zero padding
    # along H), computed once and reused by both convs.
    row_in_img = jax.lax.broadcasted_iota(jnp.int32, (NH, WC), 0) % H
    not_top = row_in_img != 0          # rows that receive the row-1 contribution
    not_bot = row_in_img != H - 1      # rows that receive the row+1 contribution

    def combine_taps(t):
        # t: (NH, >=3*WC) f32; lane slices [0,WC)/[WC,2WC)/[2WC,3WC) = dy -1/0/+1.
        # dy offsets go through the XLU (roll) + VPU (mask) -- no MXU shifts.
        t0 = t[:, 0 * WC:1 * WC]
        t1 = t[:, 1 * WC:2 * WC]
        t2 = t[:, 2 * WC:3 * WC]
        return (jnp.where(not_top, pltpu.roll(t0, shift=1, axis=0), 0.0)
                + t1
                + jnp.where(not_bot, pltpu.roll(t2, shift=NH - 1, axis=0), 0.0))

    def batchnorm(y, gamma, beta):
        # Training-mode BN (biased variance), single pass.  sum / sum-of-squares
        # are lane-concatenated so the per-channel reduce + lane re-broadcast is
        # ONE (1, 2*WC) @ (2*WC, 2*WC) matmul (all f32; stats must stay f32).
        stats = jnp.concatenate(
            [jnp.sum(y, axis=0, keepdims=True),
             jnp.sum(y * y, axis=0, keepdims=True)], axis=1)             # (1, 2*WC)
        avg = jnp.dot(stats, a_avg2, preferred_element_type=jnp.float32)  # (1, 2*WC)
        mean = avg[:, :WC]
        rstd = jax.lax.rsqrt(avg[:, WC:] - mean * mean + EPS)
        return (y - mean) * (gamma * rstd) + beta

    # conv1 (3 dy taps) + 1x1 shortcut in ONE wide bf16 MXU matmul; the dx /
    # channel taps and the zero padding along W are baked into the banded weights.
    # Conv biases dropped: exact no-op under training-mode BN.
    t = jnp.dot(x_ref[...], w1_ref[...],
                preferred_element_type=jnp.float32)        # (NH, 4*WC) f32
    c1 = combine_taps(t)
    s_pre = t[:, 3 * WC:4 * WC]                            # shortcut conv, pre-BN

    # bn1 -> relu (f32 elementwise)
    y1 = jnp.maximum(batchnorm(c1, g1_ref[...], bt1_ref[...]), 0.0)

    # conv2: one wide bf16 matmul over the three dy bands, then bn2.
    u = jnp.dot(y1.astype(jnp.bfloat16), w2_ref[...],
                preferred_element_type=jnp.float32)        # (NH, 3*WC) f32
    y2 = batchnorm(combine_taps(u), g2_ref[...], bt2_ref[...])

    # shortcut BN
    ys = batchnorm(s_pre, ge_ref[...], bte_ref[...])

    out_ref[...] = (ys + y2).astype(out_ref.dtype)         # lane-dense (NH, WC) vst


# ----------------------- wrapper-side weight reshaping ----------------------
def make_row_band(w, W):
    """w: (3, 3, Cin, Cout) HWIO -> (3, W*Cin, W*Cout) banded row-conv matrices.

    B[dy, r*Cin+ci, j*Cout+co] = w[dy, r-j+1, ci, co] when 0 <= r-j+1 < 3 else 0,
    so (flattened NHWC image row of width W) @ B[dy] is the dx/ci part of a
    padding-1 3x3 conv for vertical tap dy (W zero-padding baked into the band).
    """
    kh, kw, _, _ = w.shape
    r = jnp.arange(W)[:, None]
    j = jnp.arange(W)[None, :]
    dx = r - j + 1
    sel = (dx >= 0) & (dx < kw)
    blocks = jnp.where(sel[None, :, :, None, None],
                       w[:, jnp.clip(dx, 0, kw - 1)], 0.0)   # (3, W, W, Cin, Cout)
    Cin, Cout = blocks.shape[3], blocks.shape[4]
    return blocks.transpose(0, 1, 3, 2, 4).reshape(kh, W * Cin, W * Cout)


def make_pointwise_band(we, W):
    """we: (Cin, Cout) -> block-diagonal (W*Cin, W*Cout) for a 1x1 conv."""
    Cin, Cout = we.shape
    return (jnp.eye(W, dtype=we.dtype)[:, None, :, None]
            * we[None, :, None, :]).reshape(W * Cin, W * Cout)


def tile_chan(v, W):
    """(., C) per-channel vector -> (1, W*C) lane pattern matching index j*C+c."""
    return jnp.tile(jnp.reshape(v, (1, -1)).astype(jnp.float32), (1, W))


def prepare_operands(params, N, H, W):
    """Weight-only prep (banded weights, averaging matrix, lane-tiled BN params).

    Hoisted out of the per-step forward: dozens of XLA ops that should be cached
    across steps / hoisted out of any training scan.
    """
    Cout = params["w1"].shape[-1]
    band1 = make_row_band(params["w1"], W)              # (3, W*Cin,  WC)
    band2 = make_row_band(params["w2"], W)              # (3, WC,     WC)
    band_s = make_pointwise_band(params["we"], W)       # (W*Cin, WC)

    # conv1 dy taps + 1x1 shortcut fused along the output dim; conv2 taps fused.
    wcat1 = jnp.concatenate([band1[0], band1[1], band1[2], band_s],
                            axis=1).astype(jnp.bfloat16)        # (W*Cin, 4*WC)
    wcat2 = jnp.concatenate([band2[0], band2[1], band2[2]],
                            axis=1).astype(jnp.bfloat16)        # (WC, 3*WC)

    a_avg = jnp.tile(jnp.eye(Cout, dtype=jnp.float32), (W, W)) / float(N * H * W)
    a_avg2 = jnp.kron(jnp.eye(2, dtype=jnp.float32), a_avg)     # (2*WC, 2*WC)

    return dict(
        wcat1=wcat1, wcat2=wcat2, a_avg2=a_avg2,
        g1=tile_chan(params["g1"], W), bt1=tile_chan(params["bt1"], W),
        g2=tile_chan(params["g2"], W), bt2=tile_chan(params["bt2"], W),
        ge=tile_chan(params["ge"], W), bte=tile_chan(params["bte"], W),
    )


# --------------------------------- wrapper ---------------------------------
def resblock_forward(x_nchw, prep):
    N, Cin, H, W = x_nchw.shape
    WC = prep["wcat2"].shape[0]                # W * Cout
    Cout = WC // W
    NH = N * H

    # NCHW -> NHWC -> fold (W, C) into one lane-dense trailing dim; bf16 MXU operand.
    x2d = jnp.transpose(x_nchw, (0, 2, 3, 1)).reshape(NH, W * Cin).astype(jnp.bfloat16)

    operands = (x2d, prep["wcat1"], prep["wcat2"],
                prep["g1"], prep["bt1"], prep["g2"], prep["bt2"],
                prep["ge"], prep["bte"], prep["a_avg2"])

    flops = (2 * NH * (W * Cin) * (4 * WC)     # fused conv1 + shortcut matmul
             + 2 * NH * WC * (3 * WC)          # fused conv2 matmul
             + 3 * 2 * (2 * WC) * (2 * WC))    # BN stat matmuls (3 BNs, M=1)
    bytes_accessed = (sum(int(o.size) * o.dtype.itemsize for o in operands)
                      + 4 * NH * WC)

    out2d = pl.pallas_call(
        functools.partial(resblock_kernel, H=H),
        out_shape=jax.ShapeDtypeStruct((NH, WC), jnp.float32),
        in_specs=[pl.BlockSpec(memory_space=pltpu.MemorySpace.VMEM)] * len(operands),
        out_specs=pl.BlockSpec(memory_space=pltpu.MemorySpace.VMEM),
        compiler_params=pltpu.CompilerParams(vmem_limit_bytes=32 * 1024 * 1024),
        cost_estimate=pl.CostEstimate(flops=flops, transcendentals=3 * WC,
                                      bytes_accessed=bytes_accessed),
    )(*operands)

    return jnp.transpose(out2d.reshape(N, H, W, Cout), (0, 3, 1, 2))    # -> NCHW


# ---------------------------- pure-JAX reference ----------------------------
def resblock_reference(x_nchw, params):
    x = jnp.transpose(x_nchw, (0, 2, 3, 1))
    Cin, Cout = params["we"].shape

    def conv(xin, w, b, pad):
        y = jax.lax.conv_general_dilated(
            xin, w, (1, 1), pad, dimension_numbers=("NHWC", "HWIO", "NHWC"))
        return y + b.reshape(1, 1, 1, -1)

    def bn(y, g, bt):
        mean = jnp.mean(y, axis=(0, 1, 2), keepdims=True)
        var = jnp.mean((y - mean) ** 2, axis=(0, 1, 2), keepdims=True)
        return g.reshape(1, 1, 1, -1) * (y - mean) / jnp.sqrt(var + EPS) \
            + bt.reshape(1, 1, 1, -1)

    y1 = jax.nn.relu(bn(conv(x, params["w1"], params["b1"], "SAME"),
                        params["g1"], params["bt1"]))
    y2 = bn(conv(y1, params["w2"], params["b2"], "SAME"),
            params["g2"], params["bt2"])
    ys = bn(conv(x, params["we"].reshape(1, 1, Cin, Cout), params["be"], "VALID"),
            params["ge"], params["bte"])
    return jnp.transpose(ys + y2, (0, 3, 1, 2))


def init_params(key, ch_in, ch_out):
    ks = jax.random.split(key, 4)
    zeros = jnp.zeros((1, ch_out), jnp.float32)
    ones = jnp.ones((1, ch_out), jnp.float32)
    return {
        # conv1: 3x3, ch_in -> ch_out (HWIO)
        "w1": 0.2 * jax.random.normal(ks[0], (3, 3, ch_in, ch_out), jnp.float32),
        "b1": 0.1 * jax.random.normal(ks[1], (1, ch_out), jnp.float32),
        "g1": ones, "bt1": zeros,
        # conv2: 3x3, ch_out -> ch_out
        "w2": 0.2 * jax.random.normal(ks[2], (3, 3, ch_out, ch_out), jnp.float32),
        "b2": 0.05 * jnp.ones((1, ch_out), jnp.float32),
        "g2": ones, "bt2": zeros,
        # shortcut: 1x1, ch_in -> ch_out
        "we": 0.2 * jax.random.normal(ks[3], (ch_in, ch_out), jnp.float32),
        "be": zeros,
        "ge": ones, "bte": zeros,
    }


if __name__ == "__main__":
    key = jax.random.PRNGKey(0)
    kx, kp = jax.random.split(key)

    N, ch_in, ch_out, H, W = 2, 4, 8, 16, 16
    x = jax.random.normal(kx, (N, ch_in, H, W), jnp.float32)
    params = init_params(kp, ch_in, ch_out)

    prep = prepare_operands(params, N, H, W)     # hoisted weight prep (cache me)
    out = jax.block_until_ready(resblock_forward(x, prep))
    ref = jax.block_until_ready(resblock_reference(x, params))

    assert out.shape == (N, ch_out, H, W), out.shape
    # bf16 MXU operands (f32 accumulation / f32 BN math) vs. a pure-f32 reference.
    err = float(jnp.max(jnp.abs(out - ref)))
    assert jnp.allclose(out, ref, rtol=5e-2, atol=5e-2), err
    print("KERNEL_OK")
</pallas_src>

<mosaic_0001>
module attributes {stable_mosaic.version = 11 : i64} {
  func.func @resblock_kernel(%arg0: memref<32x64xbf16, #tpu.memory_space<vmem>>, %arg1: memref<64x512xbf16, #tpu.memory_space<vmem>>, %arg2: memref<128x384xbf16, #tpu.memory_space<vmem>>, %arg3: memref<1x128xf32, #tpu.memory_space<vmem>>, %arg4: memref<1x128xf32, #tpu.memory_space<vmem>>, %arg5: memref<1x128xf32, #tpu.memory_space<vmem>>, %arg6: memref<1x128xf32, #tpu.memory_space<vmem>>, %arg7: memref<1x128xf32, #tpu.memory_space<vmem>>, %arg8: memref<1x128xf32, #tpu.memory_space<vmem>>, %arg9: memref<256x256xf32, #tpu.memory_space<vmem>>, %arg10: memref<32x128xf32, #tpu.memory_space<vmem>>) attributes {dimension_semantics = [], scalar_prefetch = 0 : i64, scratch_operands = 0 : i64, tpu.core_type = #tpu.core_type<tc>} {
    %c0 = arith.constant 0 : index
    %c0_0 = arith.constant 0 : index
    %0 = vector.load %arg9[%c0, %c0_0] : memref<256x256xf32, #tpu.memory_space<vmem>>, vector<256x256xf32>
    %1 = tpu.iota {dimensions = array<i32: 0>} : vector<32x128xi32>
    %c16_i32 = arith.constant 16 : i32
    %c0_i32 = arith.constant 0 : i32
    %2 = arith.cmpi eq, %c16_i32, %c0_i32 : i32
    %c1_i32 = arith.constant 1 : i32
    %3 = arith.select %2, %c1_i32, %c16_i32 : i32
    %4 = vector.broadcast %3 : i32 to vector<32x128xi32>
    %5 = arith.remsi %1, %4 : vector<32x128xi32>
    %c0_i32_1 = arith.constant 0 : i32
    %6 = vector.broadcast %c0_i32_1 : i32 to vector<32x128xi32>
    %7 = arith.cmpi ne, %5, %6 : vector<32x128xi32>
    %c0_i32_2 = arith.constant 0 : i32
    %8 = vector.broadcast %c0_i32_2 : i32 to vector<32x128xi32>
    %9 = arith.cmpi slt, %5, %8 : vector<32x128xi32>
    %c0_i32_3 = arith.constant 0 : i32
    %10 = arith.cmpi slt, %3, %c0_i32_3 : i32
    %11 = vector.broadcast %10 : i1 to vector<32x128xi1>
    %12 = vector.broadcast %11 : vector<32x128xi1> to vector<32x128xi1>
    %13 = arith.xori %9, %12 : vector<32x128xi1>
    %14 = arith.andi %13, %7 : vector<32x128xi1>
    %15 = vector.broadcast %3 : i32 to vector<32x128xi32>
    %16 = arith.addi %5, %15 : vector<32x128xi32>
    %17 = arith.select %14, %16, %5 : vector<32x128xi1>, vector<32x128xi32>
    %c0_i32_4 = arith.constant 0 : i32
    %18 = vector.broadcast %c0_i32_4 : i32 to vector<32x128xi32>
    %19 = arith.cmpi ne, %17, %18 : vector<32x128xi32>
    %c15_i32 = arith.constant 15 : i32
    %20 = vector.broadcast %c15_i32 : i32 to vector<32x128xi32>
    %21 = arith.cmpi ne, %17, %20 : vector<32x128xi32>
    %c0_5 = arith.constant 0 : index
    %c0_6 = arith.constant 0 : index
    %22 = vector.load %arg0[%c0_5, %c0_6] : memref<32x64xbf16, #tpu.memory_space<vmem>>, vector<32x64xbf16>
    %c0_7 = arith.constant 0 : index
    %c0_8 = arith.constant 0 : index
    %23 = vector.load %arg1[%c0_7, %c0_8] : memref<64x512xbf16, #tpu.memory_space<vmem>>, vector<64x512xbf16>
    %cst = arith.constant dense<0.000000e+00> : vector<32x512xf32>
    %24 = tpu.matmul %22, %23, %cst {dimension_numbers = #tpu.dot_dimension_numbers<[1], [0], [0], [1], [0, 0, 1, 1], [], []>} : vector<32x64xbf16>, vector<64x512xbf16>, vector<32x512xf32> -> vector<32x512xf32>
    %25 = vector.extract_strided_slice %24 {offsets = [0, 0], sizes = [32, 128], strides = [1, 1]} : vector<32x512xf32> to vector<32x128xf32>
    %26 = vector.extract_strided_slice %24 {offsets = [0, 128], sizes = [32, 128], strides = [1, 1]} : vector<32x512xf32> to vector<32x128xf32>
    %27 = vector.extract_strided_slice %24 {offsets = [0, 256], sizes = [32, 128], strides = [1, 1]} : vector<32x512xf32> to vector<32x128xf32>
    %c1_i32_9 = arith.constant 1 : i32
    %28 = tpu.dynamic_rotate %25 by %c1_i32_9 dim 0 : vector<32x128xf32>, i32 -> vector<32x128xf32>
    %cst_10 = arith.constant 0.000000e+00 : f32
    %29 = vector.broadcast %cst_10 : f32 to vector<32x128xf32>
    %30 = arith.select %19, %28, %29 : vector<32x128xi1>, vector<32x128xf32>
    %31 = arith.addf %30, %26 : vector<32x128xf32>
    %c31_i32 = arith.constant 31 : i32
    %32 = tpu.dynamic_rotate %27 by %c31_i32 dim 0 : vector<32x128xf32>, i32 -> vector<32x128xf32>
    %cst_11 = arith.constant 0.000000e+00 : f32
    %33 = vector.broadcast %cst_11 : f32 to vector<32x128xf32>
    %34 = arith.select %21, %32, %33 : vector<32x128xi1>, vector<32x128xf32>
    %35 = arith.addf %31, %34 : vector<32x128xf32>
    %36 = vector.extract_strided_slice %24 {offsets = [0, 384], sizes = [32, 128], strides = [1, 1]} : vector<32x512xf32> to vector<32x128xf32>
    %c0_12 = arith.constant 0 : index
    %c0_13 = arith.constant 0 : index
    %37 = vector.load %arg3[%c0_12, %c0_13] : memref<1x128xf32, #tpu.memory_space<vmem>>, vector<1x128xf32>
    %c0_14 = arith.constant 0 : index
    %c0_15 = arith.constant 0 : index
    %38 = vector.load %arg4[%c0_14, %c0_15] : memref<1x128xf32, #tpu.memory_space<vmem>>, vector<1x128xf32>
    %cst_16 = arith.constant dense<0.000000e+00> : vector<128xf32>
    %39 = vector.multi_reduction <add>, %35, %cst_16 [0] : vector<32x128xf32> to vector<128xf32>
    %40 = vector.shape_cast %39 : vector<128xf32> to vector<1x128xf32>
    %41 = arith.mulf %35, %35 : vector<32x128xf32>
    %cst_17 = arith.constant dense<0.000000e+00> : vector<128xf32>
    %42 = vector.multi_reduction <add>, %41, %cst_17 [0] : vector<32x128xf32> to vector<128xf32>
    %43 = vector.shape_cast %42 : vector<128xf32> to vector<1x128xf32>
    %44 = tpu.concatenate %40, %43 in 1 : vector<1x128xf32>, vector<1x128xf32> -> vector<1x256xf32>
    %cst_18 = arith.constant dense<0.000000e+00> : vector<1x256xf32>
    %45 = tpu.matmul %44, %0, %cst_18 {dimension_numbers = #tpu.dot_dimension_numbers<[1], [0], [0], [1], [0, 0, 1, 1], [], []>} : vector<1x256xf32>, vector<256x256xf32>, vector<1x256xf32> -> vector<1x256xf32>
    %46 = vector.extract_strided_slice %45 {offsets = [0, 0], sizes = [1, 128], strides = [1, 1]} : vector<1x256xf32> to vector<1x128xf32>
    %47 = vector.extract_strided_slice %45 {offsets = [0, 128], sizes = [1, 128], strides = [1, 1]} : vector<1x256xf32> to vector<1x128xf32>
    %48 = arith.mulf %46, %46 : vector<1x128xf32>
    %49 = arith.subf %47, %48 : vector<1x128xf32>
    %cst_19 = arith.constant 9.99999974E-6 : f32
    %50 = vector.broadcast %cst_19 : f32 to vector<1x128xf32>
    %51 = arith.addf %49, %50 : vector<1x128xf32>
    %52 = math.rsqrt %51 : vector<1x128xf32>
    %53 = vector.broadcast %46 : vector<1x128xf32> to vector<32x128xf32>
    %54 = arith.subf %35, %53 : vector<32x128xf32>
    %55 = arith.mulf %37, %52 : vector<1x128xf32>
    %56 = vector.broadcast %55 : vector<1x128xf32> to vector<32x128xf32>
    %57 = arith.mulf %54, %56 : vector<32x128xf32>
    %58 = vector.broadcast %38 : vector<1x128xf32> to vector<32x128xf32>
    %59 = arith.addf %57, %58 : vector<32x128xf32>
    %cst_20 = arith.constant 0.000000e+00 : f32
    %60 = vector.broadcast %cst_20 : f32 to vector<32x128xf32>
    %61 = arith.maximumf %59, %60 : vector<32x128xf32>
    %62 = arith.truncf %61 : vector<32x128xf32> to vector<32x128xbf16>
    %c0_21 = arith.constant 0 : index
    %c0_22 = arith.constant 0 : index
    %63 = vector.load %arg2[%c0_21, %c0_22] : memref<128x384xbf16, #tpu.memory_space<vmem>>, vector<128x384xbf16>
    %cst_23 = arith.constant dense<0.000000e+00> : vector<32x384xf32>
    %64 = tpu.matmul %62, %63, %cst_23 {dimension_numbers = #tpu.dot_dimension_numbers<[1], [0], [0], [1], [0, 0, 1, 1], [], []>} : vector<32x128xbf16>, vector<128x384xbf16>, vector<32x384xf32> -> vector<32x384xf32>
    %65 = vector.extract_strided_slice %64 {offsets = [0, 0], sizes = [32, 128], strides = [1, 1]} : vector<32x384xf32> to vector<32x128xf32>
    %66 = vector.extract_strided_slice %64 {offsets = [0, 128], sizes = [32, 128], strides = [1, 1]} : vector<32x384xf32> to vector<32x128xf32>
    %67 = vector.extract_strided_slice %64 {offsets = [0, 256], sizes = [32, 128], strides = [1, 1]} : vector<32x384xf32> to vector<32x128xf32>
    %c1_i32_24 = arith.constant 1 : i32
    %68 = tpu.dynamic_rotate %65 by %c1_i32_24 dim 0 : vector<32x128xf32>, i32 -> vector<32x128xf32>
    %cst_25 = arith.constant 0.000000e+00 : f32
    %69 = vector.broadcast %cst_25 : f32 to vector<32x128xf32>
    %70 = arith.select %19, %68, %69 : vector<32x128xi1>, vector<32x128xf32>
    %71 = arith.addf %70, %66 : vector<32x128xf32>
    %c31_i32_26 = arith.constant 31 : i32
    %72 = tpu.dynamic_rotate %67 by %c31_i32_26 dim 0 : vector<32x128xf32>, i32 -> vector<32x128xf32>
    %cst_27 = arith.constant 0.000000e+00 : f32
    %73 = vector.broadcast %cst_27 : f32 to vector<32x128xf32>
    %74 = arith.select %21, %72, %73 : vector<32x128xi1>, vector<32x128xf32>
    %75 = arith.addf %71, %74 : vector<32x128xf32>
    %c0_28 = arith.constant 0 : index
    %c0_29 = arith.constant 0 : index
    %76 = vector.load %arg5[%c0_28, %c0_29] : memref<1x128xf32, #tpu.memory_space<vmem>>, vector<1x128xf32>
    %c0_30 = arith.constant 0 : index
    %c0_31 = arith.constant 0 : index
    %77 = vector.load %arg6[%c0_30, %c0_31] : memref<1x128xf32, #tpu.memory_space<vmem>>, vector<1x128xf32>
    %cst_32 = arith.constant dense<0.000000e+00> : vector<128xf32>
    %78 = vector.multi_reduction <add>, %75, %cst_32 [0] : vector<32x128xf32> to vector<128xf32>
    %79 = vector.shape_cast %78 : vector<128xf32> to vector<1x128xf32>
    %80 = arith.mulf %75, %75 : vector<32x128xf32>
    %cst_33 = arith.constant dense<0.000000e+00> : vector<128xf32>
    %81 = vector.multi_reduction <add>, %80, %cst_33 [0] : vector<32x128xf32> to vector<128xf32>
    %82 = vector.shape_cast %81 : vector<128xf32> to vector<1x128xf32>
    %83 = tpu.concatenate %79, %82 in 1 : vector<1x128xf32>, vector<1x128xf32> -> vector<1x256xf32>
    %cst_34 = arith.constant dense<0.000000e+00> : vector<1x256xf32>
    %84 = tpu.matmul %83, %0, %cst_34 {dimension_numbers = #tpu.dot_dimension_numbers<[1], [0], [0], [1], [0, 0, 1, 1], [], []>} : vector<1x256xf32>, vector<256x256xf32>, vector<1x256xf32> -> vector<1x256xf32>
    %85 = vector.extract_strided_slice %84 {offsets = [0, 0], sizes = [1, 128], strides = [1, 1]} : vector<1x256xf32> to vector<1x128xf32>
    %86 = vector.extract_strided_slice %84 {offsets = [0, 128], sizes = [1, 128], strides = [1, 1]} : vector<1x256xf32> to vector<1x128xf32>
    %87 = arith.mulf %85, %85 : vector<1x128xf32>
    %88 = arith.subf %86, %87 : vector<1x128xf32>
    %cst_35 = arith.constant 9.99999974E-6 : f32
    %89 = vector.broadcast %cst_35 : f32 to vector<1x128xf32>
    %90 = arith.addf %88, %89 : vector<1x128xf32>
    %91 = math.rsqrt %90 : vector<1x128xf32>
    %92 = vector.broadcast %85 : vector<1x128xf32> to vector<32x128xf32>
    %93 = arith.subf %75, %92 : vector<32x128xf32>
    %94 = arith.mulf %76, %91 : vector<1x128xf32>
    %95 = vector.broadcast %94 : vector<1x128xf32> to vector<32x128xf32>
    %96 = arith.mulf %93, %95 : vector<32x128xf32>
    %97 = vector.broadcast %77 : vector<1x128xf32> to vector<32x128xf32>
    %98 = arith.addf %96, %97 : vector<32x128xf32>
    %c0_36 = arith.constant 0 : index
    %c0_37 = arith.constant 0 : index
    %99 = vector.load %arg7[%c0_36, %c0_37] : memref<1x128xf32, #tpu.memory_space<vmem>>, vector<1x128xf32>
    %c0_38 = arith.constant 0 : index
    %c0_39 = arith.constant 0 : index
    %100 = vector.load %arg8[%c0_38, %c0_39] : memref<1x128xf32, #tpu.memory_space<vmem>>, vector<1x128xf32>
    %cst_40 = arith.constant dense<0.000000e+00> : vector<128xf32>
    %101 = vector.multi_reduction <add>, %36, %cst_40 [0] : vector<32x128xf32> to vector<128xf32>
    %102 = vector.shape_cast %101 : vector<128xf32> to vector<1x128xf32>
    %103 = arith.mulf %36, %36 : vector<32x128xf32>
    %cst_41 = arith.constant dense<0.000000e+00> : vector<128xf32>
    %104 = vector.multi_reduction <add>, %103, %cst_41 [0] : vector<32x128xf32> to vector<128xf32>
    %105 = vector.shape_cast %104 : vector<128xf32> to vector<1x128xf32>
    %106 = tpu.concatenate %102, %105 in 1 : vector<1x128xf32>, vector<1x128xf32> -> vector<1x256xf32>
    %cst_42 = arith.constant dense<0.000000e+00> : vector<1x256xf32>
    %107 = tpu.matmul %106, %0, %cst_42 {dimension_numbers = #tpu.dot_dimension_numbers<[1], [0], [0], [1], [0, 0, 1, 1], [], []>} : vector<1x256xf32>, vector<256x256xf32>, vector<1x256xf32> -> vector<1x256xf32>
    %108 = vector.extract_strided_slice %107 {offsets = [0, 0], sizes = [1, 128], strides = [1, 1]} : vector<1x256xf32> to vector<1x128xf32>
    %109 = vector.extract_strided_slice %107 {offsets = [0, 128], sizes = [1, 128], strides = [1, 1]} : vector<1x256xf32> to vector<1x128xf32>
    %110 = arith.mulf %108, %108 : vector<1x128xf32>
    %111 = arith.subf %109, %110 : vector<1x128xf32>
    %cst_43 = arith.constant 9.99999974E-6 : f32
    %112 = vector.broadcast %cst_43 : f32 to vector<1x128xf32>
    %113 = arith.addf %111, %112 : vector<1x128xf32>
    %114 = math.rsqrt %113 : vector<1x128xf32>
    %115 = vector.broadcast %108 : vector<1x128xf32> to vector<32x128xf32>
    %116 = arith.subf %36, %115 : vector<32x128xf32>
    %117 = arith.mulf %99, %114 : vector<1x128xf32>
    %118 = vector.broadcast %117 : vector<1x128xf32> to vector<32x128xf32>
    %119 = arith.mulf %116, %118 : vector<32x128xf32>
    %120 = vector.broadcast %100 : vector<1x128xf32> to vector<32x128xf32>
    %121 = arith.addf %119, %120 : vector<32x128xf32>
    %122 = arith.addf %121, %98 : vector<32x128xf32>
    %c0_44 = arith.constant 0 : index
    %c0_45 = arith.constant 0 : index
    %123 = vector.load %arg10[%c0_44, %c0_45] : memref<32x128xf32, #tpu.memory_space<vmem>>, vector<32x128xf32>
    tpu.vector_store %arg10[%c0_44, %c0_45], %122 {strides = array<i32>} : memref<32x128xf32, #tpu.memory_space<vmem>>, vector<32x128xf32>,
    return
  }
}

</mosaic_0001>

<bundles_post_ra>
// kernel: tpu_custom_call.1
= control target key start
LH: loop header
LB: loop body
LE: loop exit
PB: predicated region body
PF: predicated region fallthrough
CT: control target
= control target key end

     0   :  { %15 = vsyncpa [#allocation3], 0  ;;  %s2041_s0 = inlined_call_operand.hbm [shape: bf16[32,64], index: 0, kind: input, shape index: {}]   ;;  %s2042_s1 = inlined_call_operand.hbm [shape: bf16[64,512], index: 1, kind: input, shape index: {}]   ;;  %s2043_s2 = inlined_call_operand.hbm [shape: bf16[128,384], index: 2, kind: input, shape index: {}]   ;;  %s2044_s3 = inlined_call_operand.vmem [shape: f32[1,128], index: 3, kind: input, shape index: {}]   ;;  %s2045_s4 = inlined_call_operand.vmem [shape: f32[1,128], index: 4, kind: input, shape index: {}]   ;;  %s2046_s5 = inlined_call_operand.vmem [shape: f32[1,128], index: 5, kind: input, shape index: {}]   ;;  %s2047_s6 = inlined_call_operand.vmem [shape: f32[1,128], index: 6, kind: input, shape index: {}]   ;;  %s2048_s7 = inlined_call_operand.vmem [shape: f32[1,128], index: 7, kind: input, shape index: {}]   ;;  %s2049_s8 = inlined_call_operand.vmem [shape: f32[1,128], index: 8, kind: input, shape index: {}]   ;;  %s2050_s9 = inlined_call_operand.hbm [shape: f32[256,256], index: 9, kind: input, shape index: {}]   ;;  %s2051_s10 = inlined_call_operand.hbm [shape: f32[32,128], index: 10, kind: output, shape index: {}]  }
   0x1   :  { %16 = vsyncpa [#allocation6], 0 }
   0x2   :  { %17 = vsyncpa [#allocation9], 0 }
   0x3   :  { %18 = vsyncpa [#allocation4], 0  ;;  %s1450_s13 = smov [#allocation5]  }
   0x4   :  { %s36_s14 = sshll.u32 %s1450_s13, 4  ;;  %s37_s14 = int_to_ptr.vmem [resolvable:$true] %s36_s14 }
   0x5   :  { %s1350_s15 = scalar_lea.vmem %s37_s14, 2048  ;;  %p1355_p1 = scmp.lt.s32.totalorder %s37_s14, %s37_s14 }
   0x6   :  { %p1351_p0 = scmp.ne.s32.totalorder %s37_s14, %s1350_s15  ;;  %p1356_p2 = scmp.lt.s32.totalorder %s1350_s15, %s1350_s15 }
   0x8   :  { %p1357_p3 = por %p1356_p2, %p1355_p1 }
   0xa   :  { %p1358_p4 = pnand %p1357_p3, %p1351_p0 }
   0xc   :  { %1361 = shalt.err (!%p1358_p4)
}
   0xd   :  { %s1451_s16 = smov 256   ;;  %s1452_s17 = smov 16  }
   0xe   :  { %42 = dma.hbm_to_vmem [thread:$0]  %s2042_s1, 2048, %s37_s14, [#allocation6], %s1451_s16, %s1451_s16, %s1452_s17  }
   0xf   :  { %s1453_s20 = smov [#allocation2]  }
  0x10   :  { %s24_s21 = sshll.u32 %s1453_s20, 4  ;;  %s25_s21 = int_to_ptr.vmem [resolvable:$true] %s24_s21 }
  0x11   :  { %s1370_s22 = scalar_lea.vmem %s25_s21, 256  ;;  %p1375_p6 = scmp.lt.s32.totalorder %s25_s21, %s25_s21 }
  0x12   :  { %p1371_p5 = scmp.ne.s32.totalorder %s25_s21, %s1370_s22  ;;  %p1376_p7 = scmp.lt.s32.totalorder %s1370_s22, %s1370_s22 }
  0x14   :  { %p1377_p8 = por %p1376_p7, %p1375_p6 }
  0x16   :  { %p1378_p9 = pnand %p1377_p8, %p1371_p5 }
  0x18   :  { %1381 = shalt.err (!%p1378_p9)
}
  0x19   :  { %s1454_s23 = smov 64   ;;  %s1455_s24 = smov 4  }
  0x1a   :  { %30 = dma.hbm_to_vmem [thread:$0]  %s2041_s0, 256, %s25_s21, [#allocation3], %s1454_s23, %s1454_s23, %s1455_s24  }
  0x1b   :  { %s1456_s27 = smov [#allocation7]  }
  0x1c   :  { %s48_s28 = sshll.u32 %s1456_s27, 4  ;;  %s49_s28 = int_to_ptr.vmem [resolvable:$true] %s48_s28 }
  0x1d   :  { %s1390_s1 = scalar_lea.vmem %s49_s28, 3072  ;;  %p1395_p11 = scmp.lt.s32.totalorder %s49_s28, %s49_s28 }
  0x1e   :  { %p1391_p10 = scmp.ne.s32.totalorder %s49_s28, %s1390_s1  ;;  %p1396_p12 = scmp.lt.s32.totalorder %s1390_s1, %s1390_s1 }
  0x20   :  { %p1397_p13 = por %p1396_p12, %p1395_p11 }
  0x22   :  { %p1398_p0 = pnand %p1397_p13, %p1391_p10 }
  0x24   :  { %1401 = shalt.err (!%p1398_p0)
}
  0x25   :  { %s1457_s29 = smov 192   ;;  %s1458_s30 = smov 12  }
  0x26   :  { %54 = dma.hbm_to_vmem [thread:$0]  %s2043_s2, 3072, %s49_s28, [#allocation6], %s1457_s29, %s1457_s29, %s1458_s30  }
  0x27   :  { %s1459_s13 = smov [#allocation8]  }
  0x28   :  { %s72_s14 = sshll.u32 %s1459_s13, 4  ;;  %s73_s14 = int_to_ptr.vmem [resolvable:$true] %s72_s14 }
  0x29   :  { %s1410_s0 = scalar_lea.vmem %s73_s14, 8192  ;;  %p1415_p2 = scmp.lt.s32.totalorder %s73_s14, %s73_s14 }
  0x2a   :  { %p1411_p1 = scmp.ne.s32.totalorder %s73_s14, %s1410_s0  ;;  %p1416_p3 = scmp.lt.s32.totalorder %s1410_s0, %s1410_s0 }
  0x2c   :  { %p1417_p4 = por %p1416_p3, %p1415_p2 }
  0x2e   :  { %p1418_p5 = pnand %p1417_p4, %p1411_p1 }
  0x30   :  { %1421 = shalt.err (!%p1418_p5)
}
  0x31   :  { %78 = dma.hbm_to_vmem [thread:$0]  %s2050_s9, 8192, %s73_s14, [#allocation9], %s1451_s16, %s1451_s16, %s1452_s17  }
  0x32   :  { %1442 = dma.done.wait [#allocation3], 256  }
  0x33   :  { %1443 = vsyncadd [#allocation3], 4294967040 }
  0x34   :  { %1444 = dma.done.wait [#allocation6], 5120  }
  0x35   :  { %1445 = vsyncadd [#allocation6], 4294962176 }
  0x36   :  { %1446 = dma.done.wait [#allocation9], 8192  }
  0x37   :  { %1447 = vsyncadd [#allocation9], 4294959104  ;;  %v2052_v0 = vmov 0   ;;  %v1278_v1 = vld [vmem:[#allocation5 + $0x64] ss:$16 sps:$4 sm:$0xff]   ;;  %v1539_v17 = vld [vmem:[#allocation8 + $0xf8] sm:$0xff] }
  0x38   :  { %366 = vmatprep.mubr.bf16.mxu0 %v2052_v0  ;;  %419 = vmatprep.mubr.bf16.mxu1 %v2052_v0  ;;  %v1280_v2 = vld [vmem:[#allocation5 + $0x6c] ss:$16 sps:$4 sm:$0xff]   ;;  %v1282_v3 = vld [vmem:[#allocation5 + $0x60] ss:$16 sps:$4 sm:$0xff]   ;;  %v1283_v4 = vld [vmem:[#allocation5 + $0x68] ss:$16 sps:$4 sm:$0xff]  }
  0x39   :  { %342 = vmatprep.subr.bf16.mxu0 %v1278_v1  ;;  %395 = vmatprep.subr.bf16.mxu1 %v1280_v2  ;;  %v1284_v5 = vld [vmem:[#allocation5 + $0x44] ss:$16 sps:$4 sm:$0xff]   ;;  %v1286_v6 = vld [vmem:[#allocation5 + $0x4c] ss:$16 sps:$4 sm:$0xff]   ;;  %v1288_v7 = vld [vmem:[#allocation5 + $0x40] ss:$16 sps:$4 sm:$0xff]  }
  0x3a   :  { %343 = vmatpush1.bf16.msra.mxu0 %v1282_v3  ;;  %396 = vmatpush1.bf16.msra.mxu1 %v1283_v4  ;;  %v1289_v8 = vld [vmem:[#allocation5 + $0x48] ss:$16 sps:$4 sm:$0xff]   ;;  %v1290_v9 = vld [vmem:[#allocation5 + $0x24] ss:$16 sps:$4 sm:$0xff]   ;;  %v1292_v10 = vld [vmem:[#allocation5 + $0x2c] ss:$16 sps:$4 sm:$0xff]  }
  0x3b   :  { %344 = vmatprep.subr.bf16.mxu0 %v1284_v5  ;;  %397 = vmatprep.subr.bf16.mxu1 %v1286_v6  ;;  %v1294_v11 = vld [vmem:[#allocation5 + $0x20] ss:$16 sps:$4 sm:$0xff]   ;;  %v1295_v12 = vld [vmem:[#allocation5 + $0x28] ss:$16 sps:$4 sm:$0xff]   ;;  %v1296_v13 = vld [vmem:[#allocation5 + $0x4] ss:$16 sps:$4 sm:$0xff]  }
  0x3c   :  { %v1298_v14 = vld [vmem:[#allocation5 + $0xc] ss:$16 sps:$4 sm:$0xff]   ;;  %v1300_v15 = vld [vmem:[#allocation5] ss:$16 sps:$4 sm:$0xff]   ;;  %v1301_v16 = vld [vmem:[#allocation5 + $0x8] ss:$16 sps:$4 sm:$0xff]  }
  0x3d   :  { %2117 = vst [vmem:[#allocation15_spill] sm:$0xff] %v1539_v17  ;;  %v1302_v18 = vld [vmem:[#allocation2] sm:$0xff]   ;;  %vm327_vm0 = vcmask 523264   ;;  %v1546_v20 = vld [vmem:[#allocation8 + $0xe8] sm:$0xff]  ;;  %v1548_v21 = vld [vmem:[#allocation8 + $0xe0] sm:$0xff]  ;;  %s1461_s23 = smov [#allocation10]  }
  0x3e   :  { %345 = vmatpush1.bf16.msra.mxu0 %v1288_v7  ;;  %398 = vmatpush1.bf16.msra.mxu1 %v1289_v8  ;;  %v1542_v19 = vld [vmem:[#allocation8 + $0xf0] sm:$0xff]  ;;  %v1550_v22 = vld [vmem:[#allocation8 + $0xd8] sm:$0xff]  ;;  %v1557_v25 = vld [vmem:[#allocation8 + $0xc8] sm:$0xff]  ;;  %s1171_s24 = sshll.u32 %s1461_s23, 4  ;;  %s1172_s24 = int_to_ptr.vmem [resolvable:$true] %s1171_s24 }
  0x3f   :  { %346 = vmatprep.subr.bf16.mxu0 %v1290_v9  ;;  %399 = vmatprep.subr.bf16.mxu1 %v1292_v10  ;;  %v1554_v23 = vld [vmem:[#allocation8 + $0xd0] sm:$0xff]  ;;  %v1303_v24 = vld [vmem:[#allocation2 + $0x8] sm:$0xff]   ;;  %v1561_v26 = vld [vmem:[#allocation8 + $0xc0] sm:$0xff]  ;;  %p1427_p7 = scmp.lt.s32.totalorder %s1172_s24, %s1172_s24 }
  0x40   :  { %v1564_v27 = vld [vmem:[#allocation8 + $0xb8] sm:$0xff]  ;;  %v1567_v28 = vld [vmem:[#allocation8 + $0xb0] sm:$0xff]  ;;  %v1570_v29 = vld [vmem:[#allocation8 + $0xa8] sm:$0xff] }
  0x41   :  { %v1574_v30 = vld [vmem:[#allocation8 + $0xa0] sm:$0xff]  ;;  %v1580_v31 = vld [vmem:[#allocation8 + $0x98] sm:$0xff]  ;;  %v1583_v32 = vld [vmem:[#allocation8 + $0x90] sm:$0xff] }
  0x42   :  { %347 = vmatpush1.bf16.msra.mxu0 %v1294_v11  ;;  %400 = vmatpush1.bf16.msra.mxu1 %v1295_v12  ;;  %v1586_v33 = vld [vmem:[#allocation8 + $0x88] sm:$0xff]  ;;  %v1589_v34 = vld [vmem:[#allocation8 + $0x80] sm:$0xff]  ;;  %v1592_v35 = vld [vmem:[#allocation8 + $0x78] sm:$0xff] }
  0x43   :  { %348 = vmatprep.subr.bf16.mxu0 %v1296_v13  ;;  %401 = vmatprep.subr.bf16.mxu1 %v1298_v14  ;;  %v1595_v36 = vld [vmem:[#allocation8 + $0x70] sm:$0xff]  ;;  %v1598_v37 = vld [vmem:[#allocation8 + $0x68] sm:$0xff]  ;;  %v1601_v38 = vld [vmem:[#allocation8 + $0x60] sm:$0xff] }
  0x44   :  { %v1604_v39 = vld [vmem:[#allocation8 + $0x58] sm:$0xff]  ;;  %v1607_v40 = vld [vmem:[#allocation8 + $0x50] sm:$0xff]  ;;  %v1612_v41 = vld [vmem:[#allocation8 + $0x48] sm:$0xff] }
  0x45   :  { %v1615_v42 = vld [vmem:[#allocation8 + $0x40] sm:$0xff]  ;;  %v1618_v43 = vld [vmem:[#allocation8 + $0x38] sm:$0xff]  ;;  %v1621_v44 = vld [vmem:[#allocation8 + $0x30] sm:$0xff] }
  0x46   :  { %349 = vmatpush1.bf16.msra.mxu0 %v1300_v15  ;;  %402 = vmatpush1.bf16.msra.mxu1 %v1301_v16  ;;  %v1624_v45 = vld [vmem:[#allocation8 + $0x28] sm:$0xff]  ;;  %v1627_v46 = vld [vmem:[#allocation8 + $0x20] sm:$0xff]  ;;  %v1630_v47 = vld [vmem:[#allocation8 + $0x18] sm:$0xff] }
  0x47   :  { %498 = vmatprep.subr.mxu0 %v1539_v17  ;;  %v1633_v48 = vld [vmem:[#allocation8 + $0x10] sm:$0xff]  ;;  %v1636_v49 = vld [vmem:[#allocation8 + $0x8] sm:$0xff]  ;;  %v1639_v50 = vld [vmem:[#allocation8] sm:$0xff] }
  0x48   :  { %v1642_v51 = vld [vmem:[#allocation8 + $0x1f8] sm:$0xff]  ;;  %v1645_v52 = vld [vmem:[#allocation8 + $0x1f0] sm:$0xff]  ;;  %v1648_v53 = vld [vmem:[#allocation8 + $0x1e8] sm:$0xff] }
  0x49   :  { %1203 = vmatmul.mubr.msk.bf16.vlgmr.msra.gmra.mxu0 %vm327_vm0, %v1302_v18  ;;  %1205 = vmatmul.mubr.msk.bf16.vlgmr.msra.gmra.mxu1 %vm327_vm0, %v1302_v18  ;;  %v1651_v54 = vld [vmem:[#allocation8 + $0x1e0] sm:$0xff]  ;;  %v1654_v55 = vld [vmem:[#allocation8 + $0x1d8] sm:$0xff]  ;;  %v1657_v56 = vld [vmem:[#allocation8 + $0x1d0] sm:$0xff] }
  0x4a   :  { %376 = vmatprep.mubr.bf16.mxu0 %v2052_v0  ;;  %429 = vmatprep.mubr.bf16.mxu1 %v2052_v0  ;;  %v1660_v57 = vld [vmem:[#allocation8 + $0x1c8] sm:$0xff]  ;;  %v1663_v58 = vld [vmem:[#allocation8 + $0x1c0] sm:$0xff]  ;;  %v1666_v59 = vld [vmem:[#allocation8 + $0x1b8] sm:$0xff] }
  0x4b   :  { %499 = vmatpush1.msra.mxu0 %v1542_v19  ;;  %2118 = vst [vmem:[#allocation16_spill] sm:$0xff] %v1660_v57  ;;  %2119 = vst [vmem:[#allocation17_spill] sm:$0xff] %v1663_v58  ;;  %v1669_v60 = vld [vmem:[#allocation8 + $0x1b0] sm:$0xff]  ;;  %v1672_v61 = vld [vmem:[#allocation8 + $0x1a8] sm:$0xff] }
  0x4c   :  { %500 = vmatprep.subr.mxu0 %v1546_v20  ;;  %2120 = vst [vmem:[#allocation18_spill] sm:$0xff] %v1666_v59  ;;  %2121 = vst [vmem:[#allocation19_spill] sm:$0xff] %v1669_v60  ;;  %v1675_v62 = vld [vmem:[#allocation8 + $0x1a0] sm:$0xff]  ;;  %v1678_v63 = vld [vmem:[#allocation8 + $0x198] sm:$0xff] }
  0x4d   :  { %501 = vmatpush1.msra.mxu0 %v1548_v21  ;;  %2122 = vst [vmem:[#allocation20_spill] sm:$0xff] %v1672_v61  ;;  %2123 = vst [vmem:[#allocation21_spill] sm:$0xff] %v1675_v62  ;;  %v1681_v1 = vld [vmem:[#allocation8 + $0x190] sm:$0xff]  ;;  %v1684_v2 = vld [vmem:[#allocation8 + $0x188] sm:$0xff] }
  0x4e   :  { %502 = vmatprep.subr.mxu0 %v1550_v22  ;;  %2124 = vst [vmem:[#allocation22_spill] sm:$0xff] %v1678_v63  ;;  %2125 = vst [vmem:[#allocation23_spill] sm:$0xff] %v1681_v1  ;;  %v1687_v3 = vld [vmem:[#allocation8 + $0x180] sm:$0xff]  ;;  %v1690_v4 = vld [vmem:[#allocation8 + $0x178] sm:$0xff] }
  0x4f   :  { %503 = vmatpush1.msra.mxu0 %v1554_v23  ;;  %2126 = vst [vmem:[#allocation24_spill] sm:$0xff] %v1684_v2  ;;  %2127 = vst [vmem:[#allocation25_spill] sm:$0xff] %v1687_v3  ;;  %v1693_v5 = vld [vmem:[#allocation8 + $0x170] sm:$0xff]  ;;  %v1696_v6 = vld [vmem:[#allocation8 + $0x168] sm:$0xff] }
  0x50   :  { %504 = vmatprep.subr.mxu0 %v1557_v25  ;;  %2128 = vst [vmem:[#allocation26_spill] sm:$0xff] %v1690_v4  ;;  %2129 = vst [vmem:[#allocation27_spill] sm:$0xff] %v1693_v5  ;;  %v1699_v7 = vld [vmem:[#allocation8 + $0x160] sm:$0xff]  ;;  %v1702_v8 = vld [vmem:[#allocation8 + $0x158] sm:$0xff] }
  0x51   :  { %1204 = vmatmul.mubr.msk.bf16.gmra.mxu0 %vm327_vm0, %v1303_v24  ;;  %1206 = vmatmul.mubr.msk.bf16.gmra.mxu1 %vm327_vm0, %v1303_v24  ;;  %2130 = vst [vmem:[#allocation28_spill] sm:$0xff] %v1696_v6  ;;  %2131 = vst [vmem:[#allocation29_spill] sm:$0xff] %v1699_v7  ;;  %v1705_v9 = vld [vmem:[#allocation8 + $0x150] sm:$0xff]  ;;  %v1708_v10 = vld [vmem:[#allocation8 + $0x148] sm:$0xff] }
  0x52   :  { %505 = vmatpush1.msra.mxu0 %v1561_v26  ;;  %800 = vmatprep.mubr.bf16.mxu1 %v2052_v0  ;;  %2132 = vst [vmem:[#allocation30_spill] sm:$0xff] %v1702_v8  ;;  %2133 = vst [vmem:[#allocation31_spill] sm:$0xff] %v1705_v9  ;;  %v1711_v11 = vld [vmem:[#allocation8 + $0x140] sm:$0xff]  ;;  %v1713_v12 = vld [vmem:[#allocation8 + $0x138] sm:$0xff] }
  0x53   :  { %506 = vmatprep.subr.mxu0 %v1564_v27  ;;  %2134 = vst [vmem:[#allocation32_spill] sm:$0xff] %v1708_v10  ;;  %2135 = vst [vmem:[#allocation33_spill] sm:$0xff] %v1711_v11  ;;  %v1715_v13 = vld [vmem:[#allocation8 + $0x130] sm:$0xff]  ;;  %v1718_v14 = vld [vmem:[#allocation8 + $0x128] sm:$0xff] }
  0x54   :  { %507 = vmatpush1.msra.mxu0 %v1567_v28  ;;  %2136 = vst [vmem:[#allocation34_spill] sm:$0xff] %v1713_v12  ;;  %2137 = vst [vmem:[#allocation35_spill] sm:$0xff] %v1715_v13  ;;  %v1721_v15 = vld [vmem:[#allocation8 + $0x120] sm:$0xff]  ;;  %v1724_v16 = vld [vmem:[#allocation8 + $0x118] sm:$0xff] }
  0x55   :  { %508 = vmatprep.subr.mxu0 %v1570_v29  ;;  %2138 = vst [vmem:[#allocation36_spill] sm:$0xff] %v1718_v14  ;;  %2139 = vst [vmem:[#allocation37_spill] sm:$0xff] %v1721_v15  ;;  %v1727_v18 = vld [vmem:[#allocation8 + $0x110] sm:$0xff]  ;;  %v1730_v24 = vld [vmem:[#allocation8 + $0x108] sm:$0xff] }
  0x56   :  { %509 = vmatpush1.msra.mxu0 %v1574_v30  ;;  %2140 = vst [vmem:[#allocation38_spill] sm:$0xff] %v1724_v16  ;;  %2141 = vst [vmem:[#allocation39_spill] sm:$0xff] %v1727_v18  ;;  %v1733_v0 = vld [vmem:[#allocation8 + $0x100] sm:$0xff] }
  0x57   :  { %510 = vmatprep.subr.mxu0 %v1580_v31  ;;  %2142 = vst [vmem:[#allocation40_spill] sm:$0xff] %v1730_v24  ;;  %2143 = vst [vmem:[#allocation41_spill] sm:$0xff] %v1733_v0 }
  0x58   :  { %511 = vmatpush1.msra.mxu0 %v1583_v32 }
  0x59   :  { %512 = vmatprep.subr.mxu0 %v1586_v33 }
  0x5a   :  { %513 = vmatpush1.msra.mxu0 %v1589_v34 }
  0x5b   :  { %514 = vmatprep.subr.mxu0 %v1592_v35 }
  0x5c   :  { %515 = vmatpush1.msra.mxu0 %v1595_v36 }
  0x5d   :  { %516 = vmatprep.subr.mxu0 %v1598_v37 }
  0x5e   :  { %517 = vmatpush1.msra.mxu0 %v1601_v38 }
  0x5f   :  { %518 = vmatprep.subr.mxu0 %v1604_v39 }
  0x60   :  { %519 = vmatpush1.msra.mxu0 %v1607_v40 }
  0x61   :  { %520 = vmatprep.subr.mxu0 %v1612_v41 }
  0x62   :  { %521 = vmatpush1.msra.mxu0 %v1615_v42 }
  0x63   :  { %522 = vmatprep.subr.mxu0 %v1618_v43 }
  0x64   :  { %523 = vmatpush1.msra.mxu0 %v1621_v44 }
  0x65   :  { %524 = vmatprep.subr.mxu0 %v1624_v45 }
  0x66   :  { %525 = vmatpush1.msra.mxu0 %v1627_v46 }
  0x67   :  { %526 = vmatprep.subr.mxu0 %v1630_v47 }
  0x68   :  { %527 = vmatpush1.msra.mxu0 %v1633_v48 }
  0x69   :  { %528 = vmatprep.subr.mxu0 %v1636_v49 }
  0x6a   :  { %529 = vmatpush1.msra.mxu0 %v1639_v50 }
  0x6b   :  { %530 = vmatprep.subr.mxu0 %v1642_v51 }
  0x6c   :  { %531 = vmatpush2.msra.mxu0 %v1645_v52 }
  0x6d   :  { %532 = vmatprep.subr.mxu0 %v1648_v53 }
  0x6e   :  { %533 = vmatpush2.msra.mxu0 %v1651_v54 }
  0x6f   :  { %534 = vmatprep.subr.mxu0 %v1654_v55 }
  0x70   :  { %535 = vmatpush2.msra.mxu0 %v1657_v56 }
  0x71   :  { %536 = vmatprep.subr.mxu0 %v1660_v57 }
  0x72   :  { %537 = vmatpush2.msra.mxu0 %v1663_v58  ;;  %v2157_v58 = vmov 0 }
  0x73   :  { %538 = vmatprep.subr.mxu0 %v1666_v59 }
  0x74   :  { %539 = vmatpush2.msra.mxu0 %v1669_v60 }
  0x75   :  { %540 = vmatprep.subr.mxu0 %v1672_v61 }
  0x76   :  { %541 = vmatpush2.msra.mxu0 %v1675_v62 }
  0x77   :  { %542 = vmatprep.subr.mxu0 %v1678_v63 }
  0x78   :  { %543 = vmatpush2.msra.mxu0 %v1681_v1 }
  0x79   :  { %544 = vmatprep.subr.mxu0 %v1684_v2 }
  0x7a   :  { %545 = vmatpush2.msra.mxu0 %v1687_v3  ;;  %v2147_v3 = vmov 0 }
  0x7b   :  { %546 = vmatprep.subr.mxu0 %v1690_v4 }
  0x7c   :  { %547 = vmatpush2.msra.mxu0 %v1693_v5 }
  0x7d   :  { %548 = vmatprep.subr.mxu0 %v1696_v6 }
  0x7e   :  { %549 = vmatpush2.msra.mxu0 %v1699_v7 }
  0x7f   :  { %550 = vmatprep.subr.mxu0 %v1702_v8 }
  0x80   :  { %551 = vmatpush2.msra.mxu0 %v1705_v9 }
  0x81   :  { %552 = vmatprep.subr.mxu0 %v1708_v10 }
  0x82   :  { %553 = vmatpush2.msra.mxu0 %v1711_v11 }
  0x83   :  { %554 = vmatprep.subr.mxu0 %v1713_v12 }
  0x84   :  { %555 = vmatpush2.msra.mxu0 %v1715_v13  ;;  %v156_v13 = vlaneseq }
  0x85   :  { %556 = vmatprep.subr.mxu0 %v1718_v14 }
  0x86   :  { %557 = vmatpush2.msra.mxu0 %v1721_v15  ;;  %v1739_v14 = vshrl.u32 %v156_v13, 7 }
  0x87   :  { %558 = vmatprep.subr.mxu0 %v1724_v16 }
  0x88   :  { %559 = vmatpush2.msra.mxu0 %v1727_v18  ;;  %2144 = vst [vmem:[#allocation42_spill] sm:$0xff] %v1739_v14  ;;  %v159_v15 = vadd.s32 16, %v1739_v14  ;;  %v158_v16 = vadd.s32 8, %v1739_v14  ;;  %vm444_vm1 = vcmp.lt.s32.totalorder %v1739_v14, 1  ;;  %vm461_vm3 = vcmp.lt.s32.totalorder %v1739_v14, 7 }
  0x89   :  { %560 = vmatprep.subr.mxu0 %v1730_v24 }
  0x8a   :  { %561 = vmatpush2.msra.mxu0 %v1733_v0  ;;  %v179_v7 = vand.u32 15, %v159_v15  ;;  %v172_v0 = vand.u32 15, %v158_v16  ;;  %v165_v15 = vand.u32 15, %v1739_v14  ;;  %v2151_v16 = vmov 0 }
  0x8b   :  { %926 = vmatprep.subr.mxu0 %v1539_v17  ;;  %v160_v17 = vadd.s32 24, %v1739_v14 }
  0x8c   :  { %vm1749_vm2 = vcmp.ne.s32.totalorder %v179_v7, 0  ;;  %vm1757_vm4 = vcmp.ne.s32.totalorder %v172_v0, 15  ;;  %vm1769_vm5 = vcmp.ne.s32.totalorder %v165_v15, 0 }
  0x8d   :  { %v2148_v3 = vsel %vm1749_vm2, 4294967295, %v2147_v3  ;;  %v2152_v16 = vsel %vm1757_vm4, 4294967295, %v2151_v16 }
  0x8e   :  { %2149 = vst [vmem:[#allocation45_spill] sm:$0xff] %v2148_v3  ;;  %2153 = vst [vmem:[#allocation47_spill] sm:$0xff] %v2152_v16 }
 0x109   :  { %v368_v12 = vpop.f32.mrf.mxu0  ;;  %v421_v11 = vpop.f32.mrf.mxu1 }
 0x10a   :  { %v440_v63 = vrot.slane %v368_v12, 7 }
 0x10b   :  { %v370_v10 = vpop.f32.mrf.mxu0  ;;  %v1742_v9 = vpop.f32.mrf.mxu1 }
 0x10c   :  { %2145 = vst [vmem:[#allocation43_spill] sm:$0xff] %v1742_v9 }
 0x10d   :  { %v372_v8 = vpop.f32.mrf.mxu0  ;;  %v425_v18 = vpop.f32.mrf.mxu1 }
 0x10e   :  { %v441_v13 = vrot.slane %v372_v8, 7  ;;  %v458_v9 = vrot.slane %v425_v18, 1  ;;  %v186_v8 = vand.u32 15, %v160_v17  ;;  %v2154_v17 = vmov 0 }
 0x10f   :  { %v374_v24 = vpop.f32.mrf.mxu0  ;;  %v1745_v6 = vpop.f32.mrf.mxu1  ;;  %v2155_v17 = vsel %vm1769_vm5, 4294967295, %v2154_v17 }
 0x110   :  { %2146 = vst [vmem:[#allocation44_spill] sm:$0xff] %v1745_v6  ;;  %2156 = vst [vmem:[#allocation48_spill] sm:$0xff] %v2155_v17  ;;  %vm1775_vm6 = vcmp.ne.s32.totalorder %v186_v8, 15  ;;  %v2181_v17 = vld [vmem:[#allocation37_spill] sm:$0xff] }
 0x111   :  { %v378_v5 = vpop.f32.mrf.mxu0  ;;  %v431_v4 = vpop.f32.mrf.mxu1  ;;  %v2158_v58 = vsel %vm1775_vm6, 4294967295, %v2157_v58 }
 0x112   :  { %v442_v2 = vrot.slane %v378_v5, 7  ;;  %v459_v1 = vrot.slane %v431_v4, 1  ;;  %v447_v4 = vsel %vm444_vm1, %v440_v63, %v441_v13  ;;  %2159 = vst [vmem:[#allocation49_spill] sm:$0xff] %v2158_v58 }
 0x113   :  { %v380_v6 = vpop.f32.mrf.mxu0  ;;  %v1755_v62 = vpop.f32.mrf.mxu1  ;;  %v454_v57 = vadd.f32 %v447_v4, %v374_v24 }
 0x114   :  { %2150 = vst [vmem:[#allocation46_spill] sm:$0xff] %v1755_v62  ;;  %v463_v7 = vsel %vm461_vm3, %v458_v9, %v459_v1  ;;  %v446_v5 = vsel %vm444_vm1, %v441_v13, %v442_v2  ;;  %v457_v62 = vrot.slane %v421_v11, 1 }
 0x115   :  { %v451_v12 = vsel %vm1749_vm2, %v446_v5, 0.0  ;;  %v382_v18 = vpop.f32.mrf.mxu0  ;;  %v435_v61 = vpop.f32.mrf.mxu1  ;;  %v467_v60 = vsel %vm1757_vm4, %v463_v7, 0.0 }
 0x116   :  { %v443_v0 = vrot.slane %v382_v18, 7  ;;  %v460_v59 = vrot.slane %v435_v61, 1  ;;  %v455_v3 = vadd.f32 %v451_v12, %v380_v6  ;;  %v1789_v8 = vadd.f32 %v467_v60, %v454_v57 }
 0x117   :  { %v384_v13 = vpop.f32.mrf.mxu0  ;;  %v464_v6 = vsel %vm461_vm3, %v457_v62, %v458_v9 }
 0x118   :  { %v448_v5 = vsel %vm444_vm1, %v443_v0, %v440_v63  ;;  %v445_v15 = vsel %vm444_vm1, %v442_v2, %v443_v0  ;;  %v462_v7 = vsel %vm461_vm3, %v459_v1, %v460_v59  ;;  %v465_v61 = vsel %vm461_vm3, %v460_v59, %v457_v62 }
 0x119   :  { %v449_v11 = vsel %vm1769_vm5, %v448_v5, 0.0  ;;  %v456_v24 = vadd.f32 %v445_v15, %v384_v13  ;;  %v469_v63 = vsel %vm1775_vm6, %v465_v61, 0.0  ;;  %v1797_v4 = vadd.f32 %v462_v7, %v455_v3 }
 0x11a   :  { %v453_v18 = vadd.f32 %v449_v11, %v370_v10  ;;  %v486_v1 = vmul.f32 %v1789_v8, %v1789_v8 }
 0x11b   :  { %v1803_v57 = vadd.f32 %v469_v63, %v456_v24  ;;  %v487_v62 = vmul.f32 %v1797_v4, %v1797_v4 }
 0x11c   :  { %v1795_v2 = vadd.f32 %v464_v6, %v453_v18 }
 0x11d   :  { %v488_v12 = vmul.f32 %v1803_v57, %v1803_v57 }
 0x11e   :  { %v485_v59 = vmul.f32 %v1795_v2, %v1795_v2  ;;  %v476_v60 = vadd.f32 %v1789_v8, %v1795_v2 }
 0x120   :  { %v477_v9 = vadd.f32 %v476_v60, %v1797_v4  ;;  %v489_v10 = vadd.f32 %v486_v1, %v485_v59  ;;  %v2162_v1 = vld [vmem:[#allocation18_spill] sm:$0xff]  ;;  %v2163_v59 = vld [vmem:[#allocation19_spill] sm:$0xff] }
 0x122   :  { %v478_v3 = vadd.f32 %v477_v9, %v1803_v57  ;;  %v490_v0 = vadd.f32 %v489_v10, %v487_v62  ;;  %v2164_v62 = vld [vmem:[#allocation20_spill] sm:$0xff]  ;;  %v2165_v9 = vld [vmem:[#allocation21_spill] sm:$0xff]  ;;  %v2166_v10 = vld [vmem:[#allocation22_spill] sm:$0xff] }
 0x124   :  { %v479_v13 = vrot.slane %v478_v3, 4  ;;  %v491_v5 = vadd.f32 %v490_v0, %v488_v12  ;;  %v2168_v12 = vld [vmem:[#allocation24_spill] sm:$0xff]  ;;  %v2169_v0 = vld [vmem:[#allocation25_spill] sm:$0xff] }
 0x126   :  { %v480_v15 = vadd.f32 %v479_v13, %v478_v3  ;;  %v492_v11 = vrot.slane %v491_v5, 4  ;;  %v2167_v3 = vld [vmem:[#allocation23_spill] sm:$0xff]  ;;  %v2170_v13 = vld [vmem:[#allocation26_spill] sm:$0xff] }
 0x128   :  { %v481_v7 = vrot.slane %v480_v15, 2  ;;  %v493_v61 = vadd.f32 %v492_v11, %v491_v5  ;;  %v2171_v5 = vld [vmem:[#allocation27_spill] sm:$0xff]  ;;  %v2173_v11 = vld [vmem:[#allocation29_spill] sm:$0xff] }
 0x12a   :  { %v482_v18 = vadd.f32 %v481_v7, %v480_v15  ;;  %v494_v24 = vrot.slane %v493_v61, 2  ;;  %v2172_v15 = vld [vmem:[#allocation28_spill] sm:$0xff]  ;;  %v2174_v7 = vld [vmem:[#allocation30_spill] sm:$0xff] }
 0x12c   :  { %v495_v6 = vadd.f32 %v494_v24, %v493_v61  ;;  %v483_v63 = vrot.slane %v482_v18, 1  ;;  %v2175_v61 = vld [vmem:[#allocation31_spill] sm:$0xff]  ;;  %v2177_v24 = vld [vmem:[#allocation33_spill] sm:$0xff] }
 0x12e   :  { %v496_v16 = vrot.slane %v495_v6, 1  ;;  %v484_v60 = vadd.f32 %v483_v63, %v482_v18  ;;  %v2176_v18 = vld [vmem:[#allocation32_spill] sm:$0xff]  ;;  %v2179_v63 = vld [vmem:[#allocation35_spill] sm:$0xff] }
 0x130   :  { %v497_v58 = vadd.f32 %v496_v16, %v495_v6  ;;  %v2161_v16 = vld [vmem:[#allocation17_spill] sm:$0xff]  ;;  %v2178_v6 = vld [vmem:[#allocation34_spill] sm:$0xff] }
 0x132   :  { %562 = vmatprep.mubr.f32.mxu0 %v497_v58  ;;  %v2160_v58 = vld [vmem:[#allocation16_spill] sm:$0xff] }
 0x133   :  { %563 = vmatmul.mubr.f32.vlgmr.msra.gmra.mxu0 %v484_v60  ;;  %v2180_v60 = vld [vmem:[#allocation36_spill] sm:$0xff] }
 0x134   :  { %927 = vmatpush1.msra.mxu0 %v1542_v19 }
 0x135   :  { %928 = vmatprep.subr.mxu0 %v1546_v20 }
 0x136   :  { %929 = vmatpush1.msra.mxu0 %v1548_v21 }
 0x137   :  { %930 = vmatprep.subr.mxu0 %v1550_v22 }
 0x138   :  { %931 = vmatpush1.msra.mxu0 %v1554_v23 }
 0x139   :  { %932 = vmatprep.subr.mxu0 %v1557_v25 }
 0x13a   :  { %933 = vmatpush1.msra.mxu0 %v1561_v26 }
 0x13b   :  { %934 = vmatprep.subr.mxu0 %v1564_v27 }
 0x13c   :  { %935 = vmatpush1.msra.mxu0 %v1567_v28 }
 0x13d   :  { %936 = vmatprep.subr.mxu0 %v1570_v29 }
 0x13e   :  { %937 = vmatpush1.msra.mxu0 %v1574_v30 }
 0x13f   :  { %938 = vmatprep.subr.mxu0 %v1580_v31 }
 0x140   :  { %939 = vmatpush1.msra.mxu0 %v1583_v32 }
 0x141   :  { %940 = vmatprep.subr.mxu0 %v1586_v33 }
 0x142   :  { %941 = vmatpush1.msra.mxu0 %v1589_v34 }
 0x143   :  { %942 = vmatprep.subr.mxu0 %v1592_v35 }
 0x144   :  { %943 = vmatpush1.msra.mxu0 %v1595_v36 }
 0x145   :  { %944 = vmatprep.subr.mxu0 %v1598_v37 }
 0x146   :  { %945 = vmatpush1.msra.mxu0 %v1601_v38 }
 0x147   :  { %946 = vmatprep.subr.mxu0 %v1604_v39 }
 0x148   :  { %947 = vmatpush1.msra.mxu0 %v1607_v40 }
 0x149   :  { %948 = vmatprep.subr.mxu0 %v1612_v41 }
 0x14a   :  { %949 = vmatpush1.msra.mxu0 %v1615_v42 }
 0x14b   :  { %950 = vmatprep.subr.mxu0 %v1618_v43 }
 0x14c   :  { %951 = vmatpush1.msra.mxu0 %v1621_v44 }
 0x14d   :  { %952 = vmatprep.subr.mxu0 %v1624_v45 }
 0x14e   :  { %953 = vmatpush1.msra.mxu0 %v1627_v46 }
 0x14f   :  { %954 = vmatprep.subr.mxu0 %v1630_v47 }
 0x150   :  { %955 = vmatpush1.msra.mxu0 %v1633_v48 }
 0x151   :  { %956 = vmatprep.subr.mxu0 %v1636_v49 }
 0x152   :  { %957 = vmatpush1.msra.mxu0 %v1639_v50 }
 0x153   :  { %958 = vmatprep.subr.mxu0 %v1642_v51 }
 0x154   :  { %959 = vmatpush2.msra.mxu0 %v1645_v52 }
 0x155   :  { %960 = vmatprep.subr.mxu0 %v1648_v53 }
 0x156   :  { %961 = vmatpush2.msra.mxu0 %v1651_v54 }
 0x157   :  { %962 = vmatprep.subr.mxu0 %v1654_v55 }
 0x158   :  { %963 = vmatpush2.msra.mxu0 %v1657_v56 }
 0x159   :  { %964 = vmatprep.subr.mxu0 %v2160_v58 }
 0x15a   :  { %965 = vmatpush2.msra.mxu0 %v2161_v16  ;;  %v1895_v16 = vpop.f32.mrf.mxu1 }
 0x15b   :  { %966 = vmatprep.subr.mxu0 %v2162_v1  ;;  %v2188_v1 = vld [vmem:[#allocation44_spill] sm:$0xff] }
 0x15c   :  { %967 = vmatpush2.msra.mxu0 %v2163_v59 }
 0x15d   :  { %968 = vmatprep.subr.mxu0 %v2164_v62 }
 0x15e   :  { %969 = vmatpush2.msra.mxu0 %v2165_v9 }
 0x15f   :  { %970 = vmatprep.subr.mxu0 %v2166_v10 }
 0x160   :  { %971 = vmatpush2.msra.mxu0 %v2167_v3 }
 0x161   :  { %972 = vmatprep.subr.mxu0 %v2168_v12 }
 0x162   :  { %973 = vmatpush2.msra.mxu0 %v2169_v0 }
 0x163   :  { %974 = vmatprep.subr.mxu0 %v2170_v13  ;;  %v1319_v13 = vld [vmem:[#allocation7 + $0x30] ss:$12 sps:$4 sm:$0xff]  }
 0x164   :  { %975 = vmatpush2.msra.mxu0 %v2171_v5  ;;  %v2182_v5 = vld [vmem:[#allocation38_spill] sm:$0xff] }
 0x165   :  { %976 = vmatprep.subr.mxu0 %v2172_v15  ;;  %v2183_v15 = vld [vmem:[#allocation39_spill] sm:$0xff] }
 0x166   :  { %977 = vmatpush2.msra.mxu0 %v2173_v11  ;;  %v2184_v11 = vld [vmem:[#allocation40_spill] sm:$0xff] }
 0x167   :  { %978 = vmatprep.subr.mxu0 %v2174_v7  ;;  %v2185_v7 = vld [vmem:[#allocation41_spill] sm:$0xff] }
 0x168   :  { %979 = vmatpush2.msra.mxu0 %v2175_v61  ;;  %v1306_v61 = vld [vmem:[#allocation7 + $0xac] ss:$12 sps:$4 sm:$0xff]  }
 0x169   :  { %980 = vmatprep.subr.mxu0 %v2176_v18  ;;  %v1304_v18 = vld [vmem:[#allocation7 + $0xa8] ss:$12 sps:$4 sm:$0xff]   ;;  %768 = vmatprep.subr.bf16.mxu1 %v1306_v61  ;;  %v1322_v61 = vld [vmem:[#allocation7 + $0x18] ss:$12 sps:$4 sm:$0xff]  }
 0x16a   :  { %981 = vmatpush2.msra.mxu0 %v2177_v24  ;;  %769 = vmatpush1.bf16.msra.mxu1 %v1304_v18  ;;  %v1309_v24 = vld [vmem:[#allocation7 + $0x94] ss:$12 sps:$4 sm:$0xff]   ;;  %v1324_v18 = vld [vmem:[#allocation7 + $0x1c] ss:$12 sps:$4 sm:$0xff]  }
 0x16b   :  { %982 = vmatprep.subr.mxu0 %v2178_v6  ;;  %v1307_v6 = vld [vmem:[#allocation7 + $0x90] ss:$12 sps:$4 sm:$0xff]   ;;  %770 = vmatprep.subr.bf16.mxu1 %v1309_v24 }
 0x16c   :  { %983 = vmatpush2.msra.mxu0 %v2179_v63  ;;  %v1312_v63 = vld [vmem:[#allocation7 + $0x7c] ss:$12 sps:$4 sm:$0xff]   ;;  %v1327_v24 = vld [vmem:[#allocation7 + $0x4] ss:$12 sps:$4 sm:$0xff]  }
 0x16d   :  { %984 = vmatprep.subr.mxu0 %v2180_v60  ;;  %v1310_v60 = vld [vmem:[#allocation7 + $0x78] ss:$12 sps:$4 sm:$0xff]  }
 0x16e   :  { %985 = vmatpush2.msra.mxu0 %v2181_v17  ;;  %771 = vmatpush1.bf16.msra.mxu1 %v1307_v6  ;;  %v1315_v17 = vld [vmem:[#allocation7 + $0x64] ss:$12 sps:$4 sm:$0xff]   ;;  %v1325_v6 = vld [vmem:[#allocation7] ss:$12 sps:$4 sm:$0xff]  }
 0x16f   :  { %986 = vmatprep.subr.mxu0 %v2182_v5  ;;  %772 = vmatprep.subr.bf16.mxu1 %v1312_v63  ;;  %v1313_v5 = vld [vmem:[#allocation7 + $0x60] ss:$12 sps:$4 sm:$0xff]   ;;  %v1328_v63 = vld [vmem:[#allocation7 + $0xb0] ss:$12 sps:$4 sm:$0xff]  }
 0x170   :  { %987 = vmatpush2.msra.mxu0 %v2183_v15  ;;  %v1318_v15 = vld [vmem:[#allocation7 + $0x4c] ss:$12 sps:$4 sm:$0xff]  }
 0x171   :  { %988 = vmatprep.subr.mxu0 %v2184_v11  ;;  %v1316_v11 = vld [vmem:[#allocation7 + $0x48] ss:$12 sps:$4 sm:$0xff]  }
 0x172   :  { %989 = vmatpush2.msra.mxu0 %v2185_v7  ;;  %773 = vmatpush1.bf16.msra.mxu1 %v1310_v60  ;;  %v1321_v7 = vld [vmem:[#allocation7 + $0x34] ss:$12 sps:$4 sm:$0xff]  }
 0x173   :  { %774 = vmatprep.subr.bf16.mxu1 %v1315_v17 }
 0x176   :  { %775 = vmatpush1.bf16.msra.mxu1 %v1313_v5 }
 0x177   :  { %776 = vmatprep.subr.bf16.mxu1 %v1318_v15 }
 0x17a   :  { %777 = vmatpush1.bf16.msra.mxu1 %v1316_v11  ;;  %v1877_v11 = vsub.s32 0, %v1739_v14 }
 0x17b   :  { %778 = vmatprep.subr.bf16.mxu1 %v1321_v7 }
 0x17c   :  { %2186 = vst [vmem:[#allocation16_spill] sm:$0xff] %v1877_v11 }
 0x17e   :  { %779 = vmatpush1.bf16.msra.mxu1 %v1319_v13  ;;  %v474_v13 = vld [vmem:[%s2044_s3] sm:$0x1] }
 0x17f   :  { %780 = vmatprep.subr.bf16.mxu1 %v1324_v18 }
 0x182   :  { %781 = vmatpush1.bf16.msra.mxu1 %v1322_v61 }
 0x183   :  { %782 = vmatprep.subr.bf16.mxu1 %v1327_v24 }
 0x186   :  { %783 = vmatpush1.bf16.msra.mxu1 %v1325_v6 }
 0x187   :  { %1244 = vmatprep.subr.bf16.mxu1 %v1328_v63 }
 0x1f3   :  { %v564_v17 = vpop.f32.mrf.mxu0 }
 0x1f4   :  { %v569_v5 = vmul.f32 %v564_v17, %v564_v17  ;;  %v576_v7 = vrot.slane %v564_v17, %v1877_v11 }
 0x1f5   :  { %v566_v60 = vpop.f32.mrf.mxu0 }
 0x1f6   :  { %v570_v0 = vsub.f32 %v566_v60, %v569_v5  ;;  %v577_v24 = vsub.f32 %v1795_v2, %v576_v7  ;;  %v578_v6 = vsub.f32 %v1789_v8, %v576_v7  ;;  %v579_v5 = vsub.f32 %v1797_v4, %v576_v7  ;;  %v1329_v8 = vld [vmem:[#allocation7 + $0x98] ss:$12 sps:$4 sm:$0xff]  }
 0x1f7   :  { %v580_v60 = vsub.f32 %v1803_v57, %v576_v7  ;;  %v1042_v4 = vmul.f32 %v2188_v1, %v2188_v1  ;;  %v2189_v57 = vld [vmem:[#allocation46_spill] sm:$0xff] }
 0x1f8   :  { %v571_v15 = vadd.f32 1e-05, %v570_v0  ;;  %v1207_v0 = vld [vmem:[%s2045_s4] ss:$0 sm:$0xff] }
 0x1fa   :  { %1336 = vrsqrt.f32 %v571_v15 }
 0x207   :  { %v1337_v61 = vpop.eup %1336 }
 0x208   :  { %v581_v18 = vmul.f32 %v1337_v61, %v474_v13 }
 0x20a   :  { %v586_v12 = vrot.slane %v581_v18, %v1877_v11  ;;  %v2187_v11 = vld [vmem:[#allocation43_spill] sm:$0xff] }
 0x20b   :  { %v1041_v59 = vmul.f32 %v2187_v11, %v2187_v11 }
 0x20c   :  { %v588_v15 = vmul.f32 %v586_v12, %v577_v24  ;;  %v589_v14 = vmul.f32 %v586_v12, %v578_v6  ;;  %v590_v10 = vmul.f32 %v586_v12, %v579_v5  ;;  %v591_v13 = vmul.f32 %v586_v12, %v580_v60  ;;  %v1331_v60 = vld [vmem:[#allocation7 + $0x68] ss:$12 sps:$4 sm:$0xff]  }
 0x20d   :  { %v2190_v12 = vmov 0   ;;  %v1045_v24 = vadd.f32 %v1042_v4, %v1041_v59  ;;  %v1044_v6 = vmul.f32 %v1895_v16, %v1895_v16  ;;  %v1334_v59 = vld [vmem:[#allocation7 + $0x20] ss:$12 sps:$4 sm:$0xff]  }
 0x20e   :  { %v598_v3 = vadd.f32 %v1207_v0, %v588_v15  ;;  %v599_v17 = vadd.f32 %v1207_v0, %v589_v14  ;;  %v600_v62 = vadd.f32 %v1207_v0, %v590_v10  ;;  %v601_v18 = vadd.f32 %v1207_v0, %v591_v13 }
 0x20f   :  { %v1043_v14 = vmul.f32 %v2189_v57, %v2189_v57 }
 0x210   :  { %v602_v61 = vmax.f32 %v598_v3, 0.0  ;;  %v603_v2 = vmax.f32 %v599_v17, 0.0  ;;  %v1330_v3 = vld [vmem:[#allocation7 + $0x80] ss:$12 sps:$4 sm:$0xff]   ;;  %v604_v7 = vmax.f32 %v600_v62, 0.0  ;;  %v605_v10 = vmax.f32 %v601_v18, 0.0 }
 0x211   :  { %v1046_v0 = vadd.f32 %v1045_v24, %v1043_v14  ;;  %v1333_v62 = vld [vmem:[#allocation7 + $0x38] ss:$12 sps:$4 sm:$0xff]  }
 0x212   :  { %v606_v9 = vpack.c.bf16 %v603_v2, %v602_v61  ;;  %v607_v5 = vpack.c.bf16 %v605_v10, %v604_v7  ;;  %v1335_v2 = vld [vmem:[#allocation7 + $0x8] ss:$12 sps:$4 sm:$0xff]  }
 0x213   :  { %v1047_v15 = vadd.f32 %v1046_v0, %v1044_v6 }
 0x214   :  { %801 = vmatmul.mubr.bf16.vlgmr.msra.gmra.mxu1 %v606_v9 }
 0x215   :  { %1245 = vmatpush3.bf16.msra.mxu1 %v1328_v63  ;;  %810 = vmatprep.mubr.bf16.mxu1 %v2190_v12  ;;  %v1332_v63 = vld [vmem:[#allocation7 + $0x50] ss:$12 sps:$4 sm:$0xff]   ;;  %v1048_v17 = vrot.slane %v1047_v15, 4 }
 0x216   :  { %1246 = vmatprep.subr.bf16.mxu1 %v1329_v8 }
 0x217   :  { %v1049_v13 = vadd.f32 %v1048_v17, %v1047_v15 }
 0x219   :  { %1247 = vmatpush3.bf16.msra.mxu1 %v1329_v8  ;;  %v1050_v61 = vrot.slane %v1049_v13, 2 }
 0x21a   :  { %1248 = vmatprep.subr.bf16.mxu1 %v1330_v3 }
 0x21b   :  { %v1051_v8 = vadd.f32 %v1050_v61, %v1049_v13  ;;  %v1030_v13 = vld [vmem:[%s2048_s7] sm:$0x1] }
 0x21c   :  { %811 = vmatmul.mubr.bf16.gmra.mxu1 %v607_v5 }
 0x21d   :  { %1249 = vmatpush3.bf16.msra.mxu1 %v1330_v3  ;;  %1260 = vmatprep.mubr.bf16.mxu1 %v606_v9  ;;  %v1052_v18 = vrot.slane %v1051_v8, 1  ;;  %v2191_v9 = vld [vmem:[#allocation15_spill] sm:$0xff] }
 0x21e   :  { %1250 = vmatprep.subr.bf16.mxu1 %v1331_v60 }
 0x21f   :  { %v1053_v4 = vadd.f32 %v1052_v18, %v1051_v8 }
 0x221   :  { %1251 = vmatpush3.bf16.msra.mxu1 %v1331_v60 }
 0x222   :  { %1252 = vmatprep.subr.bf16.mxu1 %v1332_v63 }
 0x225   :  { %1253 = vmatpush3.bf16.msra.mxu1 %v1332_v63 }
 0x226   :  { %1254 = vmatprep.subr.bf16.mxu1 %v1333_v62 }
 0x229   :  { %1255 = vmatpush3.bf16.msra.mxu1 %v1333_v62 }
 0x22a   :  { %1256 = vmatprep.subr.bf16.mxu1 %v1334_v59 }
 0x22d   :  { %1257 = vmatpush3.bf16.msra.mxu1 %v1334_v59 }
 0x22e   :  { %1258 = vmatprep.subr.bf16.mxu1 %v1335_v2 }
 0x231   :  { %1259 = vmatpush3.bf16.msra.mxu1 %v1335_v2 }
 0x232   :  { %1054 = vmatprep.subr.mxu1 %v2191_v9 }
 0x234   :  { %1261 = vmatmul.mubr.bf16.vlgmr.msra.gmra.mxu1 %v607_v5 }
 0x235   :  { %1055 = vmatpush1.msra.mxu1 %v1542_v19  ;;  %1118 = vmatprep.mubr.f32.mxu1 %v1053_v4  ;;  %v1032_v19 = vadd.f32 %v2188_v1, %v2187_v11 }
 0x236   :  { %1056 = vmatprep.subr.mxu1 %v1546_v20 }
 0x237   :  { %1057 = vmatpush1.msra.mxu1 %v1548_v21  ;;  %v1033_v20 = vadd.f32 %v1032_v19, %v2189_v57 }
 0x238   :  { %1058 = vmatprep.subr.mxu1 %v1550_v22  ;;  %v2192_v22 = vld [vmem:[#allocation17_spill] sm:$0xff] }
 0x239   :  { %1059 = vmatpush1.msra.mxu1 %v1554_v23  ;;  %v1034_v21 = vadd.f32 %v1033_v20, %v1895_v16  ;;  %v2193_v23 = vld [vmem:[#allocation18_spill] sm:$0xff] }
 0x23a   :  { %1060 = vmatprep.subr.mxu1 %v1557_v25  ;;  %v2194_v25 = vld [vmem:[#allocation19_spill] sm:$0xff] }
 0x23b   :  { %1061 = vmatpush1.msra.mxu1 %v1561_v26  ;;  %v1035_v26 = vrot.slane %v1034_v21, 4 }
 0x23c   :  { %1062 = vmatprep.subr.mxu1 %v1564_v27  ;;  %v2195_v27 = vld [vmem:[#allocation20_spill] sm:$0xff] }
 0x23d   :  { %1063 = vmatpush1.msra.mxu1 %v1567_v28  ;;  %v2196_v28 = vld [vmem:[#allocation21_spill] sm:$0xff] }
 0x23e   :  { %1064 = vmatprep.subr.mxu1 %v1570_v29  ;;  %v2197_v29 = vld [vmem:[#allocation22_spill] sm:$0xff] }
 0x23f   :  { %1065 = vmatpush1.msra.mxu1 %v1574_v30  ;;  %v2198_v30 = vld [vmem:[#allocation23_spill] sm:$0xff] }
 0x240   :  { %1066 = vmatprep.subr.mxu1 %v1580_v31  ;;  %v1036_v31 = vadd.f32 %v1035_v26, %v1034_v21 }
 0x241   :  { %1067 = vmatpush1.msra.mxu1 %v1583_v32  ;;  %v2199_v32 = vld [vmem:[#allocation24_spill] sm:$0xff] }
 0x242   :  { %1068 = vmatprep.subr.mxu1 %v1586_v33  ;;  %v2200_v33 = vld [vmem:[#allocation25_spill] sm:$0xff] }
 0x243   :  { %1069 = vmatpush1.msra.mxu1 %v1589_v34  ;;  %v2201_v34 = vld [vmem:[#allocation26_spill] sm:$0xff] }
 0x244   :  { %1070 = vmatprep.subr.mxu1 %v1592_v35  ;;  %v2202_v35 = vld [vmem:[#allocation27_spill] sm:$0xff] }
 0x245   :  { %1071 = vmatpush1.msra.mxu1 %v1595_v36  ;;  %v1037_v36 = vrot.slane %v1036_v31, 2 }
 0x246   :  { %1072 = vmatprep.subr.mxu1 %v1598_v37  ;;  %v2203_v37 = vld [vmem:[#allocation28_spill] sm:$0xff] }
 0x247   :  { %1073 = vmatpush1.msra.mxu1 %v1601_v38  ;;  %v2204_v38 = vld [vmem:[#allocation29_spill] sm:$0xff] }
 0x248   :  { %1074 = vmatprep.subr.mxu1 %v1604_v39  ;;  %v2205_v39 = vld [vmem:[#allocation30_spill] sm:$0xff] }
 0x249   :  { %1075 = vmatpush1.msra.mxu1 %v1607_v40  ;;  %v2206_v40 = vld [vmem:[#allocation31_spill] sm:$0xff] }
 0x24a   :  { %1076 = vmatprep.subr.mxu1 %v1612_v41  ;;  %v1038_v41 = vadd.f32 %v1037_v36, %v1036_v31 }
 0x24b   :  { %1077 = vmatpush1.msra.mxu1 %v1615_v42  ;;  %v2207_v42 = vld [vmem:[#allocation32_spill] sm:$0xff] }
 0x24c   :  { %1078 = vmatprep.subr.mxu1 %v1618_v43  ;;  %v2208_v43 = vld [vmem:[#allocation33_spill] sm:$0xff] }
 0x24d   :  { %1079 = vmatpush1.msra.mxu1 %v1621_v44  ;;  %v2209_v44 = vld [vmem:[#allocation34_spill] sm:$0xff] }
 0x24e   :  { %1080 = vmatprep.subr.mxu1 %v1624_v45  ;;  %v2210_v45 = vld [vmem:[#allocation35_spill] sm:$0xff] }
 0x24f   :  { %1081 = vmatpush1.msra.mxu1 %v1627_v46  ;;  %v2211_v46 = vld [vmem:[#allocation36_spill] sm:$0xff] }
 0x250   :  { %1082 = vmatprep.subr.mxu1 %v1630_v47  ;;  %v1039_v47 = vrot.slane %v1038_v41, 1 }
 0x251   :  { %1083 = vmatpush1.msra.mxu1 %v1633_v48  ;;  %v2212_v48 = vld [vmem:[#allocation37_spill] sm:$0xff] }
 0x252   :  { %1084 = vmatprep.subr.mxu1 %v1636_v49  ;;  %v2213_v49 = vld [vmem:[#allocation38_spill] sm:$0xff] }
 0x253   :  { %1085 = vmatpush1.msra.mxu1 %v1639_v50  ;;  %v2214_v50 = vld [vmem:[#allocation39_spill] sm:$0xff] }
 0x254   :  { %1086 = vmatprep.subr.mxu1 %v1642_v51  ;;  %v2215_v51 = vld [vmem:[#allocation40_spill] sm:$0xff] }
 0x255   :  { %1087 = vmatpush2.msra.mxu1 %v1645_v52  ;;  %v1040_v52 = vadd.f32 %v1039_v47, %v1038_v41 }
 0x256   :  { %1088 = vmatprep.subr.mxu1 %v1648_v53  ;;  %v2216_v53 = vld [vmem:[#allocation41_spill] sm:$0xff] }
 0x257   :  { %1089 = vmatpush2.msra.mxu1 %v1651_v54 }
 0x258   :  { %1090 = vmatprep.subr.mxu1 %v1654_v55 }
 0x259   :  { %1091 = vmatpush2.msra.mxu1 %v1657_v56 }
 0x25a   :  { %1092 = vmatprep.subr.mxu1 %v2160_v58 }
 0x25b   :  { %1093 = vmatpush2.msra.mxu1 %v2192_v22 }
 0x25c   :  { %1094 = vmatprep.subr.mxu1 %v2193_v23 }
 0x25d   :  { %1095 = vmatpush2.msra.mxu1 %v2194_v25 }
 0x25e   :  { %1096 = vmatprep.subr.mxu1 %v2195_v27 }
 0x25f   :  { %1097 = vmatpush2.msra.mxu1 %v2196_v28 }
 0x260   :  { %1098 = vmatprep.subr.mxu1 %v2197_v29 }
 0x261   :  { %1099 = vmatpush2.msra.mxu1 %v2198_v30 }
 0x262   :  { %1100 = vmatprep.subr.mxu1 %v2199_v32 }
 0x263   :  { %1101 = vmatpush2.msra.mxu1 %v2200_v33 }
 0x264   :  { %1102 = vmatprep.subr.mxu1 %v2201_v34 }
 0x265   :  { %1103 = vmatpush2.msra.mxu1 %v2202_v35 }
 0x266   :  { %1104 = vmatprep.subr.mxu1 %v2203_v37 }
 0x267   :  { %1105 = vmatpush2.msra.mxu1 %v2204_v38 }
 0x268   :  { %1106 = vmatprep.subr.mxu1 %v2205_v39 }
 0x269   :  { %1107 = vmatpush2.msra.mxu1 %v2206_v40 }
 0x26a   :  { %1108 = vmatprep.subr.mxu1 %v2207_v42 }
 0x26b   :  { %1109 = vmatpush2.msra.mxu1 %v2208_v43 }
 0x26c   :  { %1110 = vmatprep.subr.mxu1 %v2209_v44 }
 0x26d   :  { %1111 = vmatpush2.msra.mxu1 %v2210_v45 }
 0x26e   :  { %1112 = vmatprep.subr.mxu1 %v2211_v46 }
 0x26f   :  { %1113 = vmatpush2.msra.mxu1 %v2212_v48 }
 0x270   :  { %1114 = vmatprep.subr.mxu1 %v2213_v49 }
 0x271   :  { %1115 = vmatpush2.msra.mxu1 %v2214_v50 }
 0x272   :  { %1116 = vmatprep.subr.mxu1 %v2215_v51 }
 0x273   :  { %1117 = vmatpush2.msra.mxu1 %v2216_v53 }
 0x274   :  { %1119 = vmatmul.mubr.f32.vlgmr.msra.gmra.mxu1 %v1040_v52 }
 0x2d4   :  { %v802_v54 = vpop.f32.mrf.mxu1 }
 0x2d5   :  { %v870_v6 = vrot.slane %v802_v54, 7 }
 0x2d6   :  { %v804_v55 = vpop.f32.mrf.mxu1 }
 0x2d8   :  { %v806_v56 = vpop.f32.mrf.mxu1 }
 0x2d9   :  { %v871_v5 = vrot.slane %v806_v56, 7 }
 0x2da   :  { %v808_v58 = vpop.f32.mrf.mxu1 }
 0x2db   :  { %v876_v8 = vsel %vm444_vm1, %v870_v6, %v871_v5 }
 0x2dc   :  { %v812_v14 = vpop.f32.mrf.mxu1  ;;  %v883_v26 = vadd.f32 %v876_v8, %v808_v58 }
 0x2dd   :  { %v872_v24 = vrot.slane %v812_v14, 7 }
 0x2de   :  { %v814_v12 = vpop.f32.mrf.mxu1 }
 0x2df   :  { %v875_v17 = vsel %vm444_vm1, %v871_v5, %v872_v24 }
 0x2e0   :  { %v816_v3 = vpop.f32.mrf.mxu1  ;;  %v880_v9 = vsel %vm1749_vm2, %v875_v17, 0.0 }
 0x2e1   :  { %v873_v7 = vrot.slane %v816_v3, 7  ;;  %v884_v27 = vadd.f32 %v880_v9, %v814_v12  ;;  %v902_v9 = vld [vmem:[%s2046_s5] sm:$0x1] }
 0x2e2   :  { %v818_v10 = vpop.f32.mrf.mxu1 }
 0x2e3   :  { %v877_v15 = vsel %vm444_vm1, %v873_v7, %v870_v6  ;;  %v874_v23 = vsel %vm444_vm1, %v872_v24, %v873_v7 }
 0x2e4   :  { %v878_v59 = vsel %vm1769_vm5, %v877_v15, 0.0  ;;  %v885_v35 = vadd.f32 %v874_v23, %v818_v10 }
 0x2e5   :  { %v882_v22 = vadd.f32 %v878_v59, %v804_v55 }
 0x2f4   :  { %v1262_v0 = vpop.f32.mrf.mxu1 }
 0x2f5   :  { %v888_v4 = vrot.slane %v1262_v0, 1 }
 0x2f6   :  { %v855_v63 = vpop.f32.mrf.mxu1 }
 0x2f7   :  { %v886_v61 = vrot.slane %v855_v63, 1 }
 0x2f8   :  { %v1263_v62 = vpop.f32.mrf.mxu1 }
 0x2f9   :  { %v889_v2 = vrot.slane %v1263_v62, 1 }
 0x2fa   :  { %v858_v19 = vpop.f32.mrf.mxu1 }
 0x2fb   :  { %v893_v20 = vsel %vm461_vm3, %v889_v2, %v886_v61  ;;  %v887_v21 = vrot.slane %v858_v19, 1  ;;  %v890_v25 = vsel %vm461_vm3, %v888_v4, %v889_v2 }
 0x2fc   :  { %v897_v31 = vsel %vm1775_vm6, %v893_v20, 0.0  ;;  %v1996_v36 = vadd.f32 %v890_v25, %v884_v27 }
 0x2fd   :  { %v891_v28 = vsel %vm461_vm3, %v887_v21, %v888_v4  ;;  %v892_v29 = vsel %vm461_vm3, %v886_v61, %v887_v21  ;;  %v2002_v39 = vadd.f32 %v897_v31, %v885_v35  ;;  %v2222_v61 = vld [vmem:[#allocation16_spill] sm:$0xff] }
 0x2fe   :  { %v895_v33 = vsel %vm1757_vm4, %v891_v28, 0.0  ;;  %v1994_v34 = vadd.f32 %v892_v29, %v882_v22  ;;  %v915_v42 = vmul.f32 %v1996_v36, %v1996_v36 }
 0x2ff   :  { %v1998_v37 = vadd.f32 %v895_v33, %v883_v26  ;;  %v916_v45 = vmul.f32 %v2002_v39, %v2002_v39 }
 0x300   :  { %v913_v38 = vmul.f32 %v1994_v34, %v1994_v34 }
 0x301   :  { %v904_v40 = vadd.f32 %v1998_v37, %v1994_v34  ;;  %v914_v41 = vmul.f32 %v1998_v37, %v1998_v37 }
 0x303   :  { %v905_v43 = vadd.f32 %v904_v40, %v1996_v36  ;;  %v917_v44 = vadd.f32 %v914_v41, %v913_v38 }
 0x305   :  { %v918_v46 = vadd.f32 %v917_v44, %v915_v42  ;;  %v906_v47 = vadd.f32 %v905_v43, %v2002_v39 }
 0x307   :  { %v919_v48 = vadd.f32 %v918_v46, %v916_v45  ;;  %v907_v49 = vrot.slane %v906_v47, 4 }
 0x309   :  { %v920_v50 = vrot.slane %v919_v48, 4  ;;  %v908_v51 = vadd.f32 %v907_v49, %v906_v47 }
 0x30b   :  { %v921_v52 = vadd.f32 %v920_v50, %v919_v48  ;;  %v909_v53 = vrot.slane %v908_v51, 2 }
 0x30d   :  { %v922_v54 = vrot.slane %v921_v52, 2  ;;  %v910_v55 = vadd.f32 %v909_v53, %v908_v51 }
 0x30f   :  { %v923_v56 = vadd.f32 %v922_v54, %v921_v52  ;;  %v911_v58 = vrot.slane %v910_v55, 1 }
 0x311   :  { %v924_v14 = vrot.slane %v923_v56, 1  ;;  %v912_v3 = vadd.f32 %v911_v58, %v910_v55 }
 0x313   :  { %v925_v12 = vadd.f32 %v924_v14, %v923_v56 }
 0x315   :  { %990 = vmatprep.mubr.f32.mxu0 %v925_v12 }
 0x316   :  { %991 = vmatmul.mubr.f32.vlgmr.msra.gmra.mxu0 %v912_v3 }
 0x334   :  { %v1120_v7 = vpop.f32.mrf.mxu1 }
 0x335   :  { %v1125_v10 = vmul.f32 %v1120_v7, %v1120_v7  ;;  %v1132_v2 = vrot.slane %v1120_v7, %v2222_v61 }
 0x336   :  { %v1122_v24 = vpop.f32.mrf.mxu1 }
 0x337   :  { %v1126_v6 = vsub.f32 %v1122_v24, %v1125_v10  ;;  %v1133_v4 = vsub.f32 %v2187_v11, %v1132_v2  ;;  %v1134_v20 = vsub.f32 %v2188_v1, %v1132_v2  ;;  %v1135_v21 = vsub.f32 %v2189_v57, %v1132_v2  ;;  %v1233_v1 = vld [vmem:[%s2049_s8] ss:$0 sm:$0xff] }
 0x338   :  { %v1136_v22 = vsub.f32 %v1895_v16, %v1132_v2  ;;  %v1232_v16 = vld [vmem:[%s2047_s6] ss:$0 sm:$0xff]  ;;  %s1422_s6 = scalar_lea.vmem %s1172_s24, 512 }
 0x339   :  { %v1127_v0 = vadd.f32 1e-05, %v1126_v6  ;;  %p1423_p6 = scmp.ne.s32.totalorder %s1172_s24, %s1422_s6  ;;  %p1428_p8 = scmp.lt.s32.totalorder %s1422_s6, %s1422_s6 }
 0x33b   :  { %1338 = vrsqrt.f32 %v1127_v0  ;;  %p1429_p9 = por %p1428_p8, %p1427_p7 }
 0x33d   :  { %p1430_p10 = pnand %p1429_p9, %p1423_p6 }
 0x348   :  { %v1339_v62 = vpop.eup %1338 }
 0x349   :  { %v1137_v59 = vmul.f32 %v1339_v62, %v1030_v13 }
 0x34b   :  { %v1142_v8 = vrot.slane %v1137_v59, %v2222_v61 }
 0x34d   :  { %v1144_v25 = vmul.f32 %v1142_v8, %v1133_v4  ;;  %v1145_v27 = vmul.f32 %v1142_v8, %v1134_v20  ;;  %v1146_v28 = vmul.f32 %v1142_v8, %v1135_v21  ;;  %v1147_v29 = vmul.f32 %v1142_v8, %v1136_v22 }
 0x34f   :  { %v1156_v38 = vadd.f32 %v1233_v1, %v1146_v28 }
 0x3d6   :  { %v992_v5 = vpop.f32.mrf.mxu0 }
 0x3d7   :  { %v997_v60 = vmul.f32 %v992_v5, %v992_v5  ;;  %v1004_v18 = vrot.slane %v992_v5, %v2222_v61 }
 0x3d8   :  { %v994_v15 = vpop.f32.mrf.mxu0 }
 0x3d9   :  { %v998_v63 = vsub.f32 %v994_v15, %v997_v60  ;;  %v1005_v26 = vsub.f32 %v1994_v34, %v1004_v18  ;;  %v1006_v30 = vsub.f32 %v1998_v37, %v1004_v18  ;;  %v1007_v31 = vsub.f32 %v1996_v36, %v1004_v18 }
 0x3da   :  { %v1008_v11 = vsub.f32 %v2002_v39, %v1004_v18  ;;  %v1154_v37 = vadd.f32 %v1233_v1, %v1144_v25  ;;  %v1155_v36 = vadd.f32 %v1233_v1, %v1145_v27  ;;  %v1157_v39 = vadd.f32 %v1233_v1, %v1147_v29 }
 0x3db   :  { %v999_v17 = vadd.f32 1e-05, %v998_v63 }
 0x3dd   :  { %1340 = vrsqrt.f32 %v999_v17 }
 0x3ea   :  { %v1341_v19 = vpop.eup %1340 }
 0x3eb   :  { %v1009_v23 = vmul.f32 %v1341_v19, %v902_v9 }
 0x3ed   :  { %v1014_v32 = vrot.slane %v1009_v23, %v2222_v61 }
 0x3ef   :  { %v1016_v57 = vmul.f32 %v1014_v32, %v1005_v26  ;;  %v1017_v33 = vmul.f32 %v1014_v32, %v1006_v30  ;;  %v1018_v34 = vmul.f32 %v1014_v32, %v1007_v31  ;;  %v1019_v35 = vmul.f32 %v1014_v32, %v1008_v11 }
 0x3f1   :  { %v1026_v40 = vadd.f32 %v1232_v16, %v1016_v57  ;;  %v1027_v41 = vadd.f32 %v1232_v16, %v1017_v33  ;;  %v1028_v42 = vadd.f32 %v1232_v16, %v1018_v34  ;;  %v1029_v43 = vadd.f32 %v1232_v16, %v1019_v35 }
 0x3f3   :  { %v1158_v44 = vadd.f32 %v1154_v37, %v1026_v40  ;;  %v1159_v45 = vadd.f32 %v1155_v36, %v1027_v41  ;;  %v1160_v46 = vadd.f32 %v1156_v38, %v1028_v42  ;;  %v1161_v47 = vadd.f32 %v1157_v39, %v1029_v43 }
 0x3f5   :  { %1162 = vst [vmem:[#allocation10] sm:$0xff] %v1158_v44  ;;  %1163 = vst [vmem:[#allocation10 + $0x8] sm:$0xff] %v1159_v45 }
 0x3f6   :  { %1164 = vst [vmem:[#allocation10 + $0x10] sm:$0xff] %v1160_v46  ;;  %1165 = vst [vmem:[#allocation10 + $0x18] sm:$0xff] %v1161_v47 }
 0x3f7   :  { %1433 = shalt.err (!%p1430_p10)
}
 0x3f8   :  { %s1462_s8 = smov 128   ;;  %s1463_s25 = smov 8  }
 0x3f9   :  { %1177 = dma.vmem_to_hbm [thread:$0]  %s1172_s24, 512, %s2051_s10, [#allocation4], %s1462_s8, %s1462_s8, %s1463_s25  }
 0x3fa   :  { %1448 = dma.done.wait [#allocation4], 512  }
 0x3fb   :  { %1449 = vsyncadd [#allocation4], 4294966784 }
 0x3fc   :  { %1181 = vsyncpa [#allocation3], 1 }
 0x3fd   :  { %1182 = vsyncpa [#allocation6], 1 }
 0x3fe   :  { %1183 = vsyncpa [#allocation9], 1 }
 0x3ff   :  { %1184 = vsyncpa [#allocation4], 1 }

</bundles_post_ra>
